<compile_context>
chip_gen: v5e
topology: v5e:2x2
jax: 0.10.0
libtpu: 0.0.40
codegen_flags: <defaults>
</compile_context>

<pallas_src>
import functools

import jax
import jax.numpy as jnp
from jax import lax
from jax.experimental import pallas as pl
from jax.experimental.pallas import tpu as pltpu


def _linear_attention_kernel(
    x_ref,        # (C, tn)       sequence tile of this batch element
    wkv_ref,      # (2H, C)       [k; v] rows of the qkv 1x1-conv weight
    wq_ref,       # (H, C)        q rows of the qkv 1x1-conv weight
    wout_ref,     # (C, H)        output 1x1-conv weight
    bias_ref,     # (C, 1)        output 1x1-conv bias
    mask_ref,     # (H, H) f32    block-diag head mask, pre-scaled by dim_head**-0.5
    o_ref,        # (C, tn)       output tile
    m_ref,        # (H, 1)  f32   running row-max of k            (scratch)
    s_ref,        # (H, 1)  f32   running softmax denominator     (scratch)
    ctx_ref,      # (H, H)  f32   running unnormalized context    (scratch)
    wfused_ref,   # (C, C)  f32   fused epilogue weight           (scratch)
    *, hidden, compute_dtype):
    phase = pl.program_id(1)
    t = pl.program_id(2)

    @pl.when((phase == 0) & (t == 0))
    def _init():
        m_ref[...] = jnp.full(m_ref.shape, -jnp.inf, dtype=m_ref.dtype)
        s_ref[...] = jnp.zeros(s_ref.shape, dtype=s_ref.dtype)
        ctx_ref[...] = jnp.zeros(ctx_ref.shape, dtype=ctx_ref.dtype)

    # ---- Phase 0: stream N tiles, accumulate online softmax stats + context.
    @pl.when(phase == 0)
    def _accumulate():
        x = x_ref[...].astype(compute_dtype)                       # (C, tn)
        kv = jnp.dot(wkv_ref[...].astype(compute_dtype), x,
                     preferred_element_type=jnp.float32)           # (2H, tn)
        k = kv[:hidden, :]                                          # (H, tn)
        v = kv[hidden:, :]                                          # (H, tn)

        m_prev = m_ref[...]                                         # (H, 1)
        m_new = jnp.maximum(m_prev, jnp.max(k, axis=-1, keepdims=True))
        alpha = jnp.exp(m_prev - m_new)                             # (H, 1)
        e = jnp.exp(k - m_new)                                      # (H, tn)

        s_ref[...] = alpha * s_ref[...] + jnp.sum(e, axis=-1, keepdims=True)
        # ctx[d, e_] += sum_n exp_k[d, n] * v[e_, n]  (rescaled by alpha).
        ctx_ref[...] = alpha * ctx_ref[...] + lax.dot_general(
            e.astype(compute_dtype), v.astype(compute_dtype),
            (((1,), (1,)), ((), ())),
            preferred_element_type=jnp.float32)                     # (H, H)
        m_ref[...] = m_new

    # ---- Phase transition: fold everything into one tiny (C, C) weight.
    @pl.when((phase == 1) & (t == 0))
    def _fold():
        inv_s = 1.0 / s_ref[...]                                    # exact, (H, 1), once/batch
        ctx_n = ctx_ref[...] * inv_s * mask_ref[...]                # mask carries the q scale
        # W'[c, d] = sum_e wout[c, e] * ctx_n[d, e]      -> (C, H)
        w_prime = lax.dot_general(
            wout_ref[...].astype(jnp.float32), ctx_n,
            (((1,), (1,)), ((), ())),
            preferred_element_type=jnp.float32)
        # Fuse the q projection too:  y = (W' @ Wq) @ x + b
        wfused_ref[...] = jnp.dot(w_prime, wq_ref[...].astype(jnp.float32),
                                  preferred_element_type=jnp.float32)   # (C, C)

    # ---- Phase 1: stream N tiles, emit lane-dense output tiles.
    @pl.when(phase == 1)
    def _emit():
        x = x_ref[...].astype(compute_dtype)                        # (C, tn)
        y = jnp.dot(wfused_ref[...].astype(compute_dtype), x,
                    preferred_element_type=jnp.float32)             # (C, tn)
        y = y + bias_ref[...].astype(jnp.float32)
        o_ref[...] = y.astype(o_ref.dtype)


def _choose_tile_n(n, max_tile=1024):
    if n <= max_tile:
        return n
    for tn in (max_tile, 512, 256, 128):
        if n % tn == 0:
            return tn
    # TODO(synk): pad/mask ragged sequence lengths instead of one full-N tile.
    return n


def linear_attention_pallas(x_ncl, w_qkv, w_out, b_out, *, heads, dim_head,
                            tile_n=None, compute_dtype=None):
    """x_ncl: (B, C, N) (PyTorch Conv1d layout). Returns (B, C, N)."""
    B, C, N = x_ncl.shape
    hidden = heads * dim_head
    assert w_qkv.shape == (3 * hidden, C, 1)
    assert w_out.shape == (C, hidden, 1)
    assert b_out.shape == (C,)

    if compute_dtype is None:
        compute_dtype = x_ncl.dtype          # bf16 models -> bf16 MXU operands
    if tile_n is None:
        tile_n = _choose_tile_n(N)
    assert N % tile_n == 0
    assert tile_n == N or tile_n % 128 == 0, "tile_n must be lane-aligned"
    nt = N // tile_n
    scale = dim_head ** (-0.5)

    # Conv1d 1x1 weights flatten to matmul form with NO transposes in (C, N)
    # layout.  Split so phase 0 touches only k/v rows and q is only used in the
    # once-per-batch fold.
    w_q = w_qkv[:hidden, :, 0]                 # (H, C)
    w_kv = w_qkv[hidden:, :, 0]                # (2H, C): rows [0,H)=k, [H,2H)=v
    w_o = w_out[:, :, 0]                       # (C, H)
    bias = b_out.reshape(C, 1)                 # (C, 1)

    # Precomputed block-diagonal head mask with the q scale folded in.
    head_id = jnp.arange(hidden, dtype=jnp.int32) // dim_head
    mask = jnp.where(head_id[:, None] == head_id[None, :],
                     jnp.float32(scale), jnp.float32(0.0))          # (H, H)

    kernel = functools.partial(_linear_attention_kernel,
                               hidden=hidden, compute_dtype=compute_dtype)

    itemsize = jnp.dtype(x_ncl.dtype).itemsize
    cost = pl.CostEstimate(
        flops=int(B * (2 * N * C * 2 * hidden          # k/v projection (phase 0)
                       + 2 * hidden * hidden * N       # context accumulation
                       + 2 * C * hidden * hidden       # wout @ ctx^T   (fold)
                       + 2 * C * hidden * C            # (...) @ wq     (fold)
                       + 2 * C * C * N)),              # fused epilogue (phase 1)
        transcendentals=int(B * (hidden * N + hidden * nt + hidden)),
        bytes_accessed=int(3 * B * C * N * itemsize    # x read twice + out once
                           + (3 * hidden * C + C * hidden + C
                              + hidden * hidden) * 4),
    )

    # Deliberate VMEM budget: double-buffered x/out tiles + resident params +
    # scratch + f32 in-kernel intermediates, with ~50% headroom.
    param_bytes = (3 * hidden * C + C * hidden + C + hidden * hidden) * 4
    tile_bytes = C * tile_n * itemsize
    scratch_bytes = (2 * hidden + hidden * hidden + C * C) * 4
    interm_bytes = 4 * hidden * tile_n * 4
    vmem_est = int(1.5 * (4 * tile_bytes + 2 * param_bytes
                          + scratch_bytes + interm_bytes))
    vmem_limit = min(max(vmem_est, 32 * 1024 * 1024), 64 * 1024 * 1024)

    # TODO(synk): for B == 1 on v7x add a second 'parallel' axis (head / N-tile
    # groups) so both TensorCores get work; for tiny C*N blocks pack several
    # batch elements per grid step (block-diag mask over 2*heads fills the
    # 256-wide MXU and amortizes the ~0.35us per-step overhead).
    return pl.pallas_call(
        kernel,
        out_shape=jax.ShapeDtypeStruct((B, C, N), x_ncl.dtype),
        grid_spec=pltpu.PrefetchScalarGridSpec(
            num_scalar_prefetch=0,
            grid=(B, 2, nt),
            in_specs=[
                # x sequence tile; re-streamed in both phases.
                # TODO(synk): pipeline_mode=pl.Buffered(3) here if the phase-1
                # x DMA shows up exposed (phase-1 compute is tiny for small C).
                pl.BlockSpec((pl.Squeezed(), C, tile_n),
                             lambda b, p, t: (b, 0, t)),
                pl.BlockSpec((2 * hidden, C), lambda b, p, t: (0, 0)),
                pl.BlockSpec((hidden, C), lambda b, p, t: (0, 0)),
                pl.BlockSpec((C, hidden), lambda b, p, t: (0, 0)),
                pl.BlockSpec((C, 1), lambda b, p, t: (0, 0)),
                pl.BlockSpec((hidden, hidden), lambda b, p, t: (0, 0)),
            ],
            # Output index frozen at tile 0 during the accumulation phase, so no
            # writeback of untouched buffers happens before phase 1 fills tiles.
            out_specs=pl.BlockSpec((pl.Squeezed(), C, tile_n),
                                   lambda b, p, t: (b, 0, t * p)),
            scratch_shapes=[
                pltpu.VMEM((hidden, 1), jnp.float32),       # running max
                pltpu.VMEM((hidden, 1), jnp.float32),       # running denom
                pltpu.VMEM((hidden, hidden), jnp.float32),  # running context
                pltpu.VMEM((C, C), jnp.float32),            # fused epilogue weight
            ],
        ),
        compiler_params=pltpu.CompilerParams(
            dimension_semantics=("parallel", "arbitrary", "arbitrary"),
            vmem_limit_bytes=vmem_limit,
        ),
        cost_estimate=cost,
    )(x_ncl, w_kv, w_q, w_o, bias, mask)


def linear_attention_ref(x, w_qkv, w_out, b_out, *, heads, dim_head):
    """Pure-JAX mirror of the PyTorch forward, for verification."""
    B, C, N = x.shape
    scale = dim_head ** (-0.5)
    qkv = jnp.einsum('bcn,oc->bon', x, w_qkv[:, :, 0])       # (B, 3H, N)
    q, k, v = jnp.split(qkv, 3, axis=1)
    rh = lambda t: t.reshape(B, heads, dim_head, N)
    q, k, v = rh(q), rh(k), rh(v)
    q = q * scale
    k = jax.nn.softmax(k, axis=-1)
    context = jnp.einsum('bhdn,bhen->bhde', k, v)
    out = jnp.einsum('bhde,bhdn->bhen', context, q)
    out = out.reshape(B, heads * dim_head, N)
    return jnp.einsum('bhn,oh->bon', out, w_out[:, :, 0]) + b_out[None, :, None]


if __name__ == "__main__":
    heads, dim_head = 4, 32
    hidden = heads * dim_head

    def make_inputs(key, B, dim, N):
        kx, kq, kw, kb = jax.random.split(key, 4)
        x = jax.random.normal(kx, (B, dim, N), dtype=jnp.float32)
        w_qkv = jax.random.normal(kq, (3 * hidden, dim, 1), dtype=jnp.float32) * 0.05
        w_out = jax.random.normal(kw, (dim, hidden, 1), dtype=jnp.float32) * 0.05
        b_out = jax.random.normal(kb, (dim,), dtype=jnp.float32) * 0.05
        return x, w_qkv, w_out, b_out

    key = jax.random.PRNGKey(0)
    k1, k2 = jax.random.split(key)

    # 1) Single-N-tile path (NT = 1), f32 MXU operands.
    x, w_qkv, w_out, b_out = make_inputs(k1, 2, 8, 128)
    y = jax.block_until_ready(
        linear_attention_pallas(x, w_qkv, w_out, b_out,
                                heads=heads, dim_head=dim_head))
    y_ref = linear_attention_ref(x, w_qkv, w_out, b_out,
                                 heads=heads, dim_head=dim_head)
    assert y.shape == (2, 8, 128)
    assert jnp.allclose(y, y_ref, atol=2e-4, rtol=1e-3), "f32 single-tile mismatch"

    # 2) Multi-N-tile path (online softmax over 3 tiles), f32 MXU operands.
    x2, w_qkv2, w_out2, b_out2 = make_inputs(k2, 2, 8, 384)
    y2 = jax.block_until_ready(
        linear_attention_pallas(x2, w_qkv2, w_out2, b_out2,
                                heads=heads, dim_head=dim_head, tile_n=128))
    y2_ref = linear_attention_ref(x2, w_qkv2, w_out2, b_out2,
                                  heads=heads, dim_head=dim_head)
    assert jnp.allclose(y2, y2_ref, atol=2e-4, rtol=1e-3), "f32 multi-tile mismatch"

    # 3) bf16 MXU-operand path (perf config); looser, norm-relative check.
    y_bf = jax.block_until_ready(
        linear_attention_pallas(x, w_qkv, w_out, b_out,
                                heads=heads, dim_head=dim_head,
                                compute_dtype=jnp.bfloat16))
    rel = jnp.linalg.norm(y_bf - y_ref) / jnp.linalg.norm(y_ref)
    assert bool(jnp.isfinite(rel)) and float(rel) < 5e-2, "bf16 path diverged"

    print("KERNEL_OK")
</pallas_src>

<mosaic_0001>
module attributes {stable_mosaic.version = 11 : i64} {
  func.func @_linear_attention_kernel(%arg0: i32, %arg1: i32, %arg2: i32, %arg3: memref<1x8x128xf32, #tpu.memory_space<vmem>>, %arg4: memref<256x8xf32, #tpu.memory_space<vmem>>, %arg5: memref<128x8xf32, #tpu.memory_space<vmem>>, %arg6: memref<8x128xf32, #tpu.memory_space<vmem>>, %arg7: memref<8x1xf32, #tpu.memory_space<vmem>>, %arg8: memref<128x128xf32, #tpu.memory_space<vmem>>, %arg9: memref<1x8x128xf32, #tpu.memory_space<vmem>>, %arg10: memref<128x1xf32, #tpu.memory_space<vmem>>, %arg11: memref<128x1xf32, #tpu.memory_space<vmem>>, %arg12: memref<128x128xf32, #tpu.memory_space<vmem>>, %arg13: memref<8x8xf32, #tpu.memory_space<vmem>>) attributes {dimension_semantics = [#tpu.dimension_semantics<parallel>, #tpu.dimension_semantics<arbitrary>, #tpu.dimension_semantics<arbitrary>], iteration_bounds = array<i64: 2, 2, 1>, scalar_prefetch = 0 : i64, scratch_operands = 4 : i64, tpu.core_type = #tpu.core_type<tc>, window_params = [{transform_indices = @transform_0, window_bounds = array<i64: 1, 8, 128>}, {pipeline_mode = #tpu.pipeline_mode<synchronous>, transform_indices = @transform_1, window_bounds = array<i64: 256, 8>}, {pipeline_mode = #tpu.pipeline_mode<synchronous>, transform_indices = @transform_2, window_bounds = array<i64: 128, 8>}, {pipeline_mode = #tpu.pipeline_mode<synchronous>, transform_indices = @transform_3, window_bounds = array<i64: 8, 128>}, {pipeline_mode = #tpu.pipeline_mode<synchronous>, transform_indices = @transform_4, window_bounds = array<i64: 8, 1>}, {pipeline_mode = #tpu.pipeline_mode<synchronous>, transform_indices = @transform_5, window_bounds = array<i64: 128, 128>}, {transform_indices = @transform_6, window_bounds = array<i64: 1, 8, 128>}]} {
    %c0_i32 = arith.constant 0 : i32
    %0 = arith.cmpi eq, %arg1, %c0_i32 : i32
    %c0_i32_0 = arith.constant 0 : i32
    %1 = arith.cmpi eq, %arg2, %c0_i32_0 : i32
    %2 = arith.andi %0, %1 : i1
    %3 = arith.extui %2 : i1 to i32
    %c0_i32_1 = arith.constant 0 : i32
    %4 = arith.cmpi ne, %3, %c0_i32_1 : i32
    scf.if %4 {
      %cst = arith.constant 0xFF800000 : f32
      %16 = vector.broadcast %cst : f32 to vector<128x1xf32>
      %c0 = arith.constant 0 : index
      %c0_8 = arith.constant 0 : index
      %17 = vector.load %arg10[%c0, %c0_8] : memref<128x1xf32, #tpu.memory_space<vmem>>, vector<128x1xf32>
      tpu.vector_store %arg10[%c0, %c0_8], %16 {strides = array<i32>} : memref<128x1xf32, #tpu.memory_space<vmem>>, vector<128x1xf32>,
      %cst_9 = arith.constant 0.000000e+00 : f32
      %18 = vector.broadcast %cst_9 : f32 to vector<128x1xf32>
      %c0_10 = arith.constant 0 : index
      %c0_11 = arith.constant 0 : index
      %19 = vector.load %arg11[%c0_10, %c0_11] : memref<128x1xf32, #tpu.memory_space<vmem>>, vector<128x1xf32>
      tpu.vector_store %arg11[%c0_10, %c0_11], %18 {strides = array<i32>} : memref<128x1xf32, #tpu.memory_space<vmem>>, vector<128x1xf32>,
      %cst_12 = arith.constant 0.000000e+00 : f32
      %20 = vector.broadcast %cst_12 : f32 to vector<128x128xf32>
      %c0_13 = arith.constant 0 : index
      %c0_14 = arith.constant 0 : index
      %21 = vector.load %arg12[%c0_13, %c0_14] : memref<128x128xf32, #tpu.memory_space<vmem>>, vector<128x128xf32>
      tpu.vector_store %arg12[%c0_13, %c0_14], %20 {strides = array<i32>} : memref<128x128xf32, #tpu.memory_space<vmem>>, vector<128x128xf32>,
    } else {
    }
    %c0_i32_2 = arith.constant 0 : i32
    %5 = arith.cmpi eq, %arg1, %c0_i32_2 : i32
    %6 = arith.extui %5 : i1 to i32
    %c0_i32_3 = arith.constant 0 : i32
    %7 = arith.cmpi ne, %6, %c0_i32_3 : i32
    scf.if %7 {
      %c0 = arith.constant 0 : index
      %c0_8 = arith.constant 0 : index
      %c0_9 = arith.constant 0 : index
      %16 = vector.load %arg3[%c0, %c0_8, %c0_9] : memref<1x8x128xf32, #tpu.memory_space<vmem>>, vector<1x8x128xf32>
      %17 = vector.shape_cast %16 : vector<1x8x128xf32> to vector<8x128xf32>
      %c0_10 = arith.constant 0 : index
      %c0_11 = arith.constant 0 : index
      %18 = vector.load %arg4[%c0_10, %c0_11] : memref<256x8xf32, #tpu.memory_space<vmem>>, vector<256x8xf32>
      %cst = arith.constant dense<0.000000e+00> : vector<256x128xf32>
      %19 = tpu.matmul %18, %17, %cst {dimension_numbers = #tpu.dot_dimension_numbers<[1], [0], [0], [1], [0, 0, 1, 1], [], []>} : vector<256x8xf32>, vector<8x128xf32>, vector<256x128xf32> -> vector<256x128xf32>
      %20 = vector.extract_strided_slice %19 {offsets = [0, 0], sizes = [128, 128], strides = [1, 1]} : vector<256x128xf32> to vector<128x128xf32>
      %21 = vector.extract_strided_slice %19 {offsets = [128, 0], sizes = [128, 128], strides = [1, 1]} : vector<256x128xf32> to vector<128x128xf32>
      %c0_12 = arith.constant 0 : index
      %c0_13 = arith.constant 0 : index
      %22 = vector.load %arg10[%c0_12, %c0_13] : memref<128x1xf32, #tpu.memory_space<vmem>>, vector<128x1xf32>
      %cst_14 = arith.constant dense<0xFF800000> : vector<128xf32>
      %23 = vector.multi_reduction <maximumf>, %20, %cst_14 [1] : vector<128x128xf32> to vector<128xf32>
      %24 = vector.shape_cast %23 : vector<128xf32> to vector<128x1xf32>
      %25 = arith.maximumf %22, %24 : vector<128x1xf32>
      %26 = arith.subf %22, %25 : vector<128x1xf32>
      %27 = math.exp %26 : vector<128x1xf32>
      %28 = vector.broadcast %25 : vector<128x1xf32> to vector<128x128xf32>
      %29 = arith.subf %20, %28 : vector<128x128xf32>
      %30 = math.exp %29 : vector<128x128xf32>
      %c0_15 = arith.constant 0 : index
      %c0_16 = arith.constant 0 : index
      %31 = vector.load %arg11[%c0_15, %c0_16] : memref<128x1xf32, #tpu.memory_space<vmem>>, vector<128x1xf32>
      %32 = arith.mulf %27, %31 : vector<128x1xf32>
      %cst_17 = arith.constant dense<0.000000e+00> : vector<128xf32>
      %33 = vector.multi_reduction <add>, %30, %cst_17 [1] : vector<128x128xf32> to vector<128xf32>
      %34 = vector.shape_cast %33 : vector<128xf32> to vector<128x1xf32>
      %35 = arith.addf %32, %34 : vector<128x1xf32>
      %c0_18 = arith.constant 0 : index
      %c0_19 = arith.constant 0 : index
      %36 = vector.load %arg11[%c0_18, %c0_19] : memref<128x1xf32, #tpu.memory_space<vmem>>, vector<128x1xf32>
      tpu.vector_store %arg11[%c0_18, %c0_19], %35 {strides = array<i32>} : memref<128x1xf32, #tpu.memory_space<vmem>>, vector<128x1xf32>,
      %c0_20 = arith.constant 0 : index
      %c0_21 = arith.constant 0 : index
      %37 = vector.load %arg12[%c0_20, %c0_21] : memref<128x128xf32, #tpu.memory_space<vmem>>, vector<128x128xf32>
      %38 = vector.broadcast %27 : vector<128x1xf32> to vector<128x128xf32>
      %39 = arith.mulf %38, %37 : vector<128x128xf32>
      %cst_22 = arith.constant dense<0.000000e+00> : vector<128x128xf32>
      %40 = tpu.matmul %30, %21, %cst_22 {dimension_numbers = #tpu.dot_dimension_numbers<[1], [1], [0], [0], [0, 0, 1, 0], [], []>} : vector<128x128xf32>, vector<128x128xf32>, vector<128x128xf32> -> vector<128x128xf32>
      %41 = arith.addf %39, %40 : vector<128x128xf32>
      %c0_23 = arith.constant 0 : index
      %c0_24 = arith.constant 0 : index
      %42 = vector.load %arg12[%c0_23, %c0_24] : memref<128x128xf32, #tpu.memory_space<vmem>>, vector<128x128xf32>
      tpu.vector_store %arg12[%c0_23, %c0_24], %41 {strides = array<i32>} : memref<128x128xf32, #tpu.memory_space<vmem>>, vector<128x128xf32>,
      %c0_25 = arith.constant 0 : index
      %c0_26 = arith.constant 0 : index
      %43 = vector.load %arg10[%c0_25, %c0_26] : memref<128x1xf32, #tpu.memory_space<vmem>>, vector<128x1xf32>
      tpu.vector_store %arg10[%c0_25, %c0_26], %25 {strides = array<i32>} : memref<128x1xf32, #tpu.memory_space<vmem>>, vector<128x1xf32>,
    } else {
    }
    %c1_i32 = arith.constant 1 : i32
    %8 = arith.cmpi eq, %arg1, %c1_i32 : i32
    %c0_i32_4 = arith.constant 0 : i32
    %9 = arith.cmpi eq, %arg2, %c0_i32_4 : i32
    %10 = arith.andi %8, %9 : i1
    %11 = arith.extui %10 : i1 to i32
    %c0_i32_5 = arith.constant 0 : i32
    %12 = arith.cmpi ne, %11, %c0_i32_5 : i32
    scf.if %12 {
      %c0 = arith.constant 0 : index
      %c0_8 = arith.constant 0 : index
      %16 = vector.load %arg11[%c0, %c0_8] : memref<128x1xf32, #tpu.memory_space<vmem>>, vector<128x1xf32>
      %cst = arith.constant 1.000000e+00 : f32
      %17 = vector.broadcast %cst : f32 to vector<128x1xf32>
      %18 = arith.divf %17, %16 : vector<128x1xf32>
      %c0_9 = arith.constant 0 : index
      %c0_10 = arith.constant 0 : index
      %19 = vector.load %arg12[%c0_9, %c0_10] : memref<128x128xf32, #tpu.memory_space<vmem>>, vector<128x128xf32>
      %20 = vector.broadcast %18 : vector<128x1xf32> to vector<128x128xf32>
      %21 = arith.mulf %19, %20 : vector<128x128xf32>
      %c0_11 = arith.constant 0 : index
      %c0_12 = arith.constant 0 : index
      %22 = vector.load %arg8[%c0_11, %c0_12] : memref<128x128xf32, #tpu.memory_space<vmem>>, vector<128x128xf32>
      %23 = arith.mulf %21, %22 : vector<128x128xf32>
      %c0_13 = arith.constant 0 : index
      %c0_14 = arith.constant 0 : index
      %24 = vector.load %arg6[%c0_13, %c0_14] : memref<8x128xf32, #tpu.memory_space<vmem>>, vector<8x128xf32>
      %cst_15 = arith.constant dense<0.000000e+00> : vector<8x128xf32>
      %25 = tpu.matmul %24, %23, %cst_15 {dimension_numbers = #tpu.dot_dimension_numbers<[1], [1], [0], [0], [0, 0, 1, 0], [], []>} : vector<8x128xf32>, vector<128x128xf32>, vector<8x128xf32> -> vector<8x128xf32>
      %c0_16 = arith.constant 0 : index
      %c0_17 = arith.constant 0 : index
      %26 = vector.load %arg5[%c0_16, %c0_17] : memref<128x8xf32, #tpu.memory_space<vmem>>, vector<128x8xf32>
      %cst_18 = arith.constant dense<0.000000e+00> : vector<8x8xf32>
      %27 = tpu.matmul %25, %26, %cst_18 {dimension_numbers = #tpu.dot_dimension_numbers<[1], [0], [0], [1], [0, 0, 1, 1], [], []>} : vector<8x128xf32>, vector<128x8xf32>, vector<8x8xf32> -> vector<8x8xf32>
      %c0_19 = arith.constant 0 : index
      %c0_20 = arith.constant 0 : index
      %28 = vector.load %arg13[%c0_19, %c0_20] : memref<8x8xf32, #tpu.memory_space<vmem>>, vector<8x8xf32>
      tpu.vector_store %arg13[%c0_19, %c0_20], %27 {strides = array<i32>} : memref<8x8xf32, #tpu.memory_space<vmem>>, vector<8x8xf32>,
    } else {
    }
    %c1_i32_6 = arith.constant 1 : i32
    %13 = arith.cmpi eq, %arg1, %c1_i32_6 : i32
    %14 = arith.extui %13 : i1 to i32
    %c0_i32_7 = arith.constant 0 : i32
    %15 = arith.cmpi ne, %14, %c0_i32_7 : i32
    scf.if %15 {
      %c0 = arith.constant 0 : index
      %c0_8 = arith.constant 0 : index
      %c0_9 = arith.constant 0 : index
      %16 = vector.load %arg3[%c0, %c0_8, %c0_9] : memref<1x8x128xf32, #tpu.memory_space<vmem>>, vector<1x8x128xf32>
      %17 = vector.shape_cast %16 : vector<1x8x128xf32> to vector<8x128xf32>
      %c0_10 = arith.constant 0 : index
      %c0_11 = arith.constant 0 : index
      %18 = vector.load %arg13[%c0_10, %c0_11] : memref<8x8xf32, #tpu.memory_space<vmem>>, vector<8x8xf32>
      %cst = arith.constant dense<0.000000e+00> : vector<8x128xf32>
      %19 = tpu.matmul %18, %17, %cst {dimension_numbers = #tpu.dot_dimension_numbers<[1], [0], [0], [1], [0, 0, 1, 1], [], []>} : vector<8x8xf32>, vector<8x128xf32>, vector<8x128xf32> -> vector<8x128xf32>
      %c0_12 = arith.constant 0 : index
      %c0_13 = arith.constant 0 : index
      %20 = vector.load %arg7[%c0_12, %c0_13] : memref<8x1xf32, #tpu.memory_space<vmem>>, vector<8x1xf32>
      %21 = vector.broadcast %20 : vector<8x1xf32> to vector<8x128xf32>
      %22 = arith.addf %19, %21 : vector<8x128xf32>
      %c0_14 = arith.constant 0 : index
      %c0_15 = arith.constant 0 : index
      %c0_16 = arith.constant 0 : index
      %23 = vector.load %arg9[%c0_14, %c0_15, %c0_16] : memref<1x8x128xf32, #tpu.memory_space<vmem>>, vector<1x8x128xf32>
      %24 = vector.shape_cast %23 : vector<1x8x128xf32> to vector<8x128xf32>
      %25 = vector.shape_cast %22 : vector<8x128xf32> to vector<1x8x128xf32>
      tpu.vector_store %arg9[%c0_14, %c0_15, %c0_16], %25 {strides = array<i32>} : memref<1x8x128xf32, #tpu.memory_space<vmem>>, vector<1x8x128xf32>,
    } else {
    }
    return
  }
  func.func @transform_0(%arg0: i32, %arg1: i32, %arg2: i32) -> (i32, i32, i32) {
    %c0_i32 = arith.constant 0 : i32
    %c0_i32_0 = arith.constant 0 : i32
    return %arg0, %c0_i32, %arg2 : i32, i32, i32
  }
  func.func @transform_1(%arg0: i32, %arg1: i32, %arg2: i32) -> (i32, i32) {
    %c0_i32 = arith.constant 0 : i32
    %c0_i32_0 = arith.constant 0 : i32
    %c0_i32_1 = arith.constant 0 : i32
    return %c0_i32, %c0_i32_0 : i32, i32
  }
  func.func @transform_2(%arg0: i32, %arg1: i32, %arg2: i32) -> (i32, i32) {
    %c0_i32 = arith.constant 0 : i32
    %c0_i32_0 = arith.constant 0 : i32
    %c0_i32_1 = arith.constant 0 : i32
    return %c0_i32, %c0_i32_0 : i32, i32
  }
  func.func @transform_3(%arg0: i32, %arg1: i32, %arg2: i32) -> (i32, i32) {
    %c0_i32 = arith.constant 0 : i32
    %c0_i32_0 = arith.constant 0 : i32
    %c0_i32_1 = arith.constant 0 : i32
    return %c0_i32, %c0_i32_0 : i32, i32
  }
  func.func @transform_4(%arg0: i32, %arg1: i32, %arg2: i32) -> (i32, i32) {
    %c0_i32 = arith.constant 0 : i32
    %c0_i32_0 = arith.constant 0 : i32
    %c0_i32_1 = arith.constant 0 : i32
    return %c0_i32, %c0_i32_0 : i32, i32
  }
  func.func @transform_5(%arg0: i32, %arg1: i32, %arg2: i32) -> (i32, i32) {
    %c0_i32 = arith.constant 0 : i32
    %c0_i32_0 = arith.constant 0 : i32
    %c0_i32_1 = arith.constant 0 : i32
    return %c0_i32, %c0_i32_0 : i32, i32
  }
  func.func @transform_6(%arg0: i32, %arg1: i32, %arg2: i32) -> (i32, i32, i32) {
    %0 = arith.muli %arg2, %arg1 : i32
    %c0_i32 = arith.constant 0 : i32
    %c0_i32_0 = arith.constant 0 : i32
    return %arg0, %c0_i32, %0 : i32, i32, i32
  }
}

</mosaic_0001>

<bundles_post_ra>
// kernel: tpu_custom_call.1
= control target key start
LH: loop header
LB: loop body
LE: loop exit
PB: predicated region body
PF: predicated region fallthrough
CT: control target
= control target key end

     0   :  { %s3215_s0 = inlined_call_operand.vmem [shape: f32[2,8,128], index: 0, kind: input, shape index: {}]   ;;  %s3216_s1 = inlined_call_operand.vmem [shape: f32[256,8], index: 1, kind: input, shape index: {}]   ;;  %s3217_s2 = inlined_call_operand.vmem [shape: f32[128,8], index: 2, kind: input, shape index: {}]   ;;  %s3218_s3 = inlined_call_operand.vmem [shape: f32[8,128], index: 3, kind: input, shape index: {}]   ;;  %s3219_s4 = inlined_call_operand.vmem [shape: f32[8,1], index: 4, kind: input, shape index: {}]   ;;  %s3220_s5 = inlined_call_operand.vmem [shape: f32[128,128], index: 5, kind: input, shape index: {}]   ;;  %s3221_s6 = inlined_call_operand.hbm [shape: f32[2,8,128], index: 6, kind: output, shape index: {}]  }
   0x1   :  { %3223 = sst [smem:[#allocation9_spill]] %s3215_s0 }
   0x2   :  { %3224 = sst [smem:[#allocation10_spill]] %s3216_s1 }
   0x3   :  { %11 = vsyncpa [#allocation7], 0 }
   0x4   :  { %13 = vsyncpa [#allocation7 + $0x1], 0  ;;  %s2122_s21 = smov 0   ;;  %s2124_s22 = smov 0  }
   0x5   :  { %s2126_s23 = smov 0   ;;  %s2128_s24 = smov 0  }
   0x6   :  { %s2130_s25 = smov 0   ;;  %s2132_s26 = smov 0  }
   0x7   :  { %s2134_s27 = smov 0   ;;  %s2136_s28 = smov 0  }
   0x8 LB: > { %s1740_s29 = sadd.s32 4294967295, %s2080_s28   ;;  %s1741_s30 = sadd.s32 4294967294, %s2080_s28   ;;  %s2080_s28 = sphi %s2136_s28, %s19_s28   ;;  %s2076_s27 = sphi %s2134_s27, %s3286_s27   ;;  %s2072_s26 = sphi %s2132_s26, %s3285_s26   ;;  %s2068_s25 = sphi %s2130_s25, %s3284_s25   ;;  %s2064_s24 = sphi %s2128_s24, %s3283_s24   ;;  %s2060_s23 = sphi %s2126_s23, %s3282_s23   ;;  %s2056_s22 = sphi %s2124_s22, %s3281_s22   ;;  %s2052_s21 = sphi %s2122_s21, %s3280_s21  }
   0x9   : > { %s34_s7 = sadd.s32 1, %s2072_s26  ;;  %s38_s8 = sadd.s32 1, %s2076_s27 }
   0xa   : > { %p36_p0 = scmp.ge.s32.totalorder %s34_s7, 2  ;;  %p192_p1 = scmp.ne.s32.totalorder %s2060_s23, %s2056_s22 }
   0xb   : > { %p193_p2 = scmp.eq.s32.totalorder %s1740_s29, 3  ;;  %p198_p4 = scmp.ne.s32.totalorder %s2056_s22, %s2052_s21 }
   0xc   : > { %s3288_s7 = smov (%p36_p0, %s34_s7), 0  ;;  %s3290_s8 = smov (!%p36_p0, %s38_s8), %s2076_s27 }
   0xd   : > { %p2171_p3 = por %p193_p2, %p192_p1  ;;  %p40_p5 = scmp.ge.s32.totalorder %s3290_s8, 2 }
   0xe   : > { %p199_p6 = scmp.eq.s32.totalorder %s1741_s30, 3  ;;  %p1744_p7 = scmp.ge.s32.totalorder %s2080_s28, 1 }
   0xf   : > { %p242_p8 = scmp.lt.s32.totalorder %s2080_s28, 5  ;;  %s3292_s8 = smov (%p40_p5, %s3290_s8), 0 }
  0x10   : > { %p2181_p9 = por %p199_p6, %p198_p4  ;;  %s177_s11 = ssub.s32 %s2076_s27, %s3292_s8 }
  0x11   : > { %p243_p10 = pnand %p1744_p7, %p242_p8  ;;  %s182_s12 = sadd.s32 1, %s2060_s23 }
  0x12   : > { %p180_p11 = scmp.eq.s32.totalorder %s177_s11, 0  ;;  %s3222_s14 = sand.u32 (!%p243_p10), 1, %s2056_s22  }
  0x13   : > { %246 = sbr.rel (%p243_p10) target bundleno = 1328 (0x530), region = 44  ;;  %p274_p12 = scmp.lt.s32.totalorder (!%p243_p10), %s2068_s25, 1 }
  0x14   : > { %s2189_s13 = scalar_select %p180_p11, %s2060_s23, %s182_s12  }
  0x15   : > { %s2195_s15 = sshll.u32 (!%p243_p10), %s3222_s14, 3  ;;  %p282_p13 = scmp.eq.s32.totalorder (!%p243_p10), %s2064_s24, 0 }
  0x16   : > { %s3227_s0 = sld [smem:[#allocation9_spill]] (!%p243_p10) }
  0x18   : > { %s275_s16 = scalar_select %p274_p12, %s2068_s25, 1  ;;  %vm288_vm0 = vcmask (%p282_p13), 7168   ;;  %v2082_v0 = vmov (%p282_p13), -inf   ;;  %v2083_v1 = vmov (%p282_p13), 0.0  }
  0x19   : > { %287 = sbr.rel (!%p282_p13) target bundleno = 73 (0x49), region = 48  ;;  %289 = vst.msk [vmem:[#allocation2] sm:$0xff] (%p282_p13), %vm288_vm0, %v2082_v0 }
  0x1a   : > { %s1746_s17 = sshll.u32 %s275_s16, 3  ;;  %290 = vst.msk [vmem:[#allocation2 + $0x8] sm:$0xff] (%p282_p13), %vm288_vm0, %v2082_v0 }
  0x1b   : > { %291 = vst.msk [vmem:[#allocation2 + $0x10] sm:$0xff] (%p282_p13), %vm288_vm0, %v2082_v0 }
  0x1c   : > { %s2202_s20 = scalar_lea.vmem %s3227_s0, %s1746_s17  ;;  %292 = vst.msk [vmem:[#allocation2 + $0x18] sm:$0xff] (%p282_p13), %vm288_vm0, %v2082_v0 }
  0x1d   : > { %293 = vst.msk [vmem:[#allocation2 + $0x20] sm:$0xff] (%p282_p13), %vm288_vm0, %v2082_v0 }
  0x1e   : > { %294 = vst.msk [vmem:[#allocation2 + $0x28] sm:$0xff] %vm288_vm0, %v2082_v0 }
  0x1f   : > { %295 = vst.msk [vmem:[#allocation2 + $0x30] sm:$0xff] %vm288_vm0, %v2082_v0 }
  0x20   : > { %296 = vst.msk [vmem:[#allocation2 + $0x38] sm:$0xff] %vm288_vm0, %v2082_v0 }
  0x21   : > { %297 = vst.msk [vmem:[#allocation2 + $0x40] sm:$0xff] %vm288_vm0, %v2082_v0 }
  0x22   : > { %298 = vst.msk [vmem:[#allocation2 + $0x48] sm:$0xff] %vm288_vm0, %v2082_v0 }
  0x23   : > { %299 = vst.msk [vmem:[#allocation2 + $0x50] sm:$0xff] %vm288_vm0, %v2082_v0 }
  0x24   : > { %300 = vst.msk [vmem:[#allocation2 + $0x58] sm:$0xff] %vm288_vm0, %v2082_v0 }
  0x25   : > { %301 = vst.msk [vmem:[#allocation2 + $0x60] sm:$0xff] %vm288_vm0, %v2082_v0 }
  0x26   : > { %302 = vst.msk [vmem:[#allocation2 + $0x68] sm:$0xff] %vm288_vm0, %v2082_v0 }
  0x27   : > { %303 = vst.msk [vmem:[#allocation2 + $0x70] sm:$0xff] %vm288_vm0, %v2082_v0 }
  0x28   : > { %304 = vst.msk [vmem:[#allocation2 + $0x78] sm:$0xff] %vm288_vm0, %v2082_v0 }
  0x29   : > { %305 = vst.msk [vmem:[#allocation3] sm:$0xff] %vm288_vm0, %v2083_v1 }
  0x2a   : > { %306 = vst.msk [vmem:[#allocation3 + $0x8] sm:$0xff] %vm288_vm0, %v2083_v1 }
  0x2b   : > { %307 = vst.msk [vmem:[#allocation3 + $0x10] sm:$0xff] %vm288_vm0, %v2083_v1 }
  0x2c   : > { %308 = vst.msk [vmem:[#allocation3 + $0x18] sm:$0xff] %vm288_vm0, %v2083_v1 }
  0x2d   : > { %309 = vst.msk [vmem:[#allocation3 + $0x20] sm:$0xff] %vm288_vm0, %v2083_v1 }
  0x2e   : > { %310 = vst.msk [vmem:[#allocation3 + $0x28] sm:$0xff] %vm288_vm0, %v2083_v1 }
  0x2f   : > { %311 = vst.msk [vmem:[#allocation3 + $0x30] sm:$0xff] %vm288_vm0, %v2083_v1 }
  0x30   : > { %312 = vst.msk [vmem:[#allocation3 + $0x38] sm:$0xff] %vm288_vm0, %v2083_v1 }
  0x31   : > { %313 = vst.msk [vmem:[#allocation3 + $0x40] sm:$0xff] %vm288_vm0, %v2083_v1 }
  0x32   : > { %314 = vst.msk [vmem:[#allocation3 + $0x48] sm:$0xff] %vm288_vm0, %v2083_v1 }
  0x33   : > { %315 = vst.msk [vmem:[#allocation3 + $0x50] sm:$0xff] %vm288_vm0, %v2083_v1 }
  0x34   : > { %316 = vst.msk [vmem:[#allocation3 + $0x58] sm:$0xff] %vm288_vm0, %v2083_v1 }
  0x35   : > { %317 = vst.msk [vmem:[#allocation3 + $0x60] sm:$0xff] %vm288_vm0, %v2083_v1 }
  0x36   : > { %318 = vst.msk [vmem:[#allocation3 + $0x68] sm:$0xff] %vm288_vm0, %v2083_v1 }
  0x37   : > { %319 = vst.msk [vmem:[#allocation3 + $0x70] sm:$0xff] %vm288_vm0, %v2083_v1 }
  0x38   : > { %320 = vst.msk [vmem:[#allocation3 + $0x78] sm:$0xff] %vm288_vm0, %v2083_v1 }
  0x39   : > { %321 = vst [vmem:[#allocation4 + $0x30] sm:$0xff] %v2083_v1 }
  0x3a   : > { %322 = vst [vmem:[#allocation4] sm:$0xff] %v2083_v1 }
  0x3b   : > { %323 = vst [vmem:[#allocation4 + $0x58] sm:$0xff] %v2083_v1 }
  0x3c   : > { %324 = vst [vmem:[#allocation4 + $0x18] sm:$0xff] %v2083_v1 }
  0x3d   : > { %325 = vst [vmem:[#allocation4 + $0x50] sm:$0xff] %v2083_v1 }
  0x3e   : > { %326 = vst [vmem:[#allocation4 + $0x68] sm:$0xff] %v2083_v1 }
  0x3f   : > { %327 = vst [vmem:[#allocation4 + $0x8] sm:$0xff] %v2083_v1 }
  0x40   : > { %328 = vst [vmem:[#allocation4 + $0x48] sm:$0xff] %v2083_v1 }
  0x41   : > { %329 = vst [vmem:[#allocation4 + $0x40] sm:$0xff] %v2083_v1 }
  0x42   : > { %330 = vst [vmem:[#allocation4 + $0x20] sm:$0xff] %v2083_v1 }
  0x43   : > { %331 = vst [vmem:[#allocation4 + $0x10] sm:$0xff] %v2083_v1 }
  0x44   : > { %332 = vst [vmem:[#allocation4 + $0x38] sm:$0xff] %v2083_v1 }
  0x45   : > { %333 = vst [vmem:[#allocation4 + $0x60] sm:$0xff] %v2083_v1 }
  0x46   : > { %334 = vst [vmem:[#allocation4 + $0x70] sm:$0xff] %v2083_v1 }
  0x47   : > { %335 = vst [vmem:[#allocation4 + $0x78] sm:$0xff] %v2083_v1 }
  0x48   : > { %336 = vst [vmem:[#allocation4 + $0x28] sm:$0xff] %v2083_v1 }
  0x49 PF: > { %p1748_p0 = scmp.ne.s32.totalorder %s2064_s24, 0 }
  0x4a   : > { %s3228_s1 = sld [smem:[#allocation10_spill]] (!%p1748_p0) }
  0x4b   : > { %339 = sbr.rel (%p1748_p0) target bundleno = 717 (0x2cd), region = 52 }
  0x50   : > { %v340_v2 = vld [vmem:[%s2202_s20] sm:$0xff]  ;;  %vm373_vm1 = vcmask 64512   ;;  %v342_v5 = vld [vmem:[%s3228_s1 + $0x8] sm:$0xff]  ;;  %v343_v7 = vld [vmem:[%s3228_s1 + $0x10] sm:$0xff]  ;;  %v2084_v60 = vmov 0   ;;  %vm903_vm2 = vcmask 7168  }
  0x51   : > { %v341_v3 = vld [vmem:[%s3228_s1] sm:$0xff]  ;;  %485 = vmatpush.msra.mxu0 %v340_v2  ;;  %1790 = vmatpush.msra.mxu2 %v340_v2  ;;  %v358_v6 = vld [vmem:[%s3228_s1 + $0x88] sm:$0xff]  ;;  %v359_v8 = vld [vmem:[%s3228_s1 + $0x90] sm:$0xff] }
  0x52   : > { %v357_v4 = vld [vmem:[%s3228_s1 + $0x80] sm:$0xff]  ;;  %1749 = vmatmul.msk.f32.vlgmr.msra.gmra.mxu0 %vm373_vm1, %v341_v3  ;;  %v344_v9 = vld [vmem:[%s3228_s1 + $0x18] sm:$0xff]  ;;  %v346_v13 = vld [vmem:[%s3228_s1 + $0x28] sm:$0xff]  ;;  %1883 = vset.pattern.permute.xlu1 %v2084_v60 }
  0x53   : > { %1765 = vmatmul.msk.f32.vlgmr.msra.gmra.mxu2 %vm373_vm1, %v357_v4  ;;  %v360_v10 = vld [vmem:[%s3228_s1 + $0x98] sm:$0xff]  ;;  %v345_v11 = vld [vmem:[%s3228_s1 + $0x20] sm:$0xff]  ;;  %v362_v14 = vld [vmem:[%s3228_s1 + $0xa8] sm:$0xff]  ;;  %1884 = vset.pattern.permute.xlu2 %v2084_v60 }
  0x54   : > { %v361_v12 = vld [vmem:[%s3228_s1 + $0xa0] sm:$0xff]  ;;  %v347_v15 = vld [vmem:[%s3228_s1 + $0x30] sm:$0xff]  ;;  %v348_v17 = vld [vmem:[%s3228_s1 + $0x38] sm:$0xff]  ;;  %1885 = vset.pattern.permute.xlu0 %v2084_v60 }
  0x55   : > { %v363_v16 = vld [vmem:[%s3228_s1 + $0xb0] sm:$0xff]  ;;  %v364_v18 = vld [vmem:[%s3228_s1 + $0xb8] sm:$0xff]  ;;  %v349_v19 = vld [vmem:[%s3228_s1 + $0x40] sm:$0xff] }
  0x56   : > { %v365_v20 = vld [vmem:[%s3228_s1 + $0xc0] sm:$0xff]  ;;  %v350_v21 = vld [vmem:[%s3228_s1 + $0x48] sm:$0xff]  ;;  %v351_v23 = vld [vmem:[%s3228_s1 + $0x50] sm:$0xff] }
  0x57   : > { %v366_v22 = vld [vmem:[%s3228_s1 + $0xc8] sm:$0xff]  ;;  %v367_v24 = vld [vmem:[%s3228_s1 + $0xd0] sm:$0xff]  ;;  %v352_v25 = vld [vmem:[%s3228_s1 + $0x58] sm:$0xff] }
  0x58   : > { %v368_v26 = vld [vmem:[%s3228_s1 + $0xd8] sm:$0xff]  ;;  %v353_v27 = vld [vmem:[%s3228_s1 + $0x60] sm:$0xff]  ;;  %v354_v29 = vld [vmem:[%s3228_s1 + $0x68] sm:$0xff] }
  0x59   : > { %v369_v28 = vld [vmem:[%s3228_s1 + $0xe0] sm:$0xff]  ;;  %v370_v30 = vld [vmem:[%s3228_s1 + $0xe8] sm:$0xff]  ;;  %v355_v31 = vld [vmem:[%s3228_s1 + $0x70] sm:$0xff] }
  0x5a   : > { %1750 = vmatmul.msk.f32.gmra.mxu0 %vm373_vm1, %v342_v5  ;;  %v371_v32 = vld [vmem:[%s3228_s1 + $0xf0] sm:$0xff]  ;;  %v356_v33 = vld [vmem:[%s3228_s1 + $0x78] sm:$0xff]  ;;  %v2432_v1 = vld [vmem:[#allocation2] sm:$0xff] }
  0x5b   : > { %1766 = vmatmul.msk.f32.gmra.mxu2 %vm373_vm1, %v358_v6  ;;  %v372_v34 = vld [vmem:[%s3228_s1 + $0xf8] sm:$0xff] }
  0x62   : > { %1751 = vmatmul.msk.f32.gmra.mxu0 %vm373_vm1, %v343_v7  ;;  %v2444_v7 = vld [vmem:[#allocation2 + $0x8] sm:$0xff] }
  0x63   : > { %1767 = vmatmul.msk.f32.gmra.mxu2 %vm373_vm1, %v359_v8 }
  0x6a   : > { %1752 = vmatmul.msk.f32.gmra.mxu0 %vm373_vm1, %v344_v9 }
  0x6b   : > { %1768 = vmatmul.msk.f32.gmra.mxu2 %vm373_vm1, %v360_v10 }
  0x72   : > { %1753 = vmatmul.msk.f32.gmra.mxu0 %vm373_vm1, %v345_v11 }
  0x73   : > { %1769 = vmatmul.msk.f32.gmra.mxu2 %vm373_vm1, %v361_v12  ;;  %v2454_v12 = vld [vmem:[#allocation2 + $0x10] sm:$0xff] }
  0x7a   : > { %1754 = vmatmul.msk.f32.gmra.mxu0 %vm373_vm1, %v346_v13 }
  0x7b   : > { %1770 = vmatmul.msk.f32.gmra.mxu2 %vm373_vm1, %v362_v14 }
  0x82   : > { %1755 = vmatmul.msk.f32.gmra.mxu0 %vm373_vm1, %v347_v15 }
  0x83   : > { %1771 = vmatmul.msk.f32.gmra.mxu2 %vm373_vm1, %v363_v16  ;;  %v2464_v16 = vld [vmem:[#allocation2 + $0x18] sm:$0xff] }
  0x8a   : > { %1756 = vmatmul.msk.f32.gmra.mxu0 %vm373_vm1, %v348_v17 }
  0x8b   : > { %1772 = vmatmul.msk.f32.gmra.mxu2 %vm373_vm1, %v364_v18 }
  0x92   : > { %1757 = vmatmul.msk.f32.gmra.mxu0 %vm373_vm1, %v349_v19 }
  0x93   : > { %1773 = vmatmul.msk.f32.gmra.mxu2 %vm373_vm1, %v365_v20  ;;  %v2475_v20 = vld [vmem:[#allocation2 + $0x20] sm:$0xff] }
  0x9a   : > { %1758 = vmatmul.msk.f32.gmra.mxu0 %vm373_vm1, %v350_v21 }
  0x9b   : > { %1774 = vmatmul.msk.f32.gmra.mxu2 %vm373_vm1, %v366_v22 }
  0xa2   : > { %1759 = vmatmul.msk.f32.gmra.mxu0 %vm373_vm1, %v351_v23 }
  0xa3   : > { %1775 = vmatmul.msk.f32.gmra.mxu2 %vm373_vm1, %v367_v24  ;;  %v2487_v24 = vld [vmem:[#allocation2 + $0x28] sm:$0xff] }
  0xaa   : > { %1760 = vmatmul.msk.f32.gmra.mxu0 %vm373_vm1, %v352_v25 }
  0xab   : > { %1776 = vmatmul.msk.f32.gmra.mxu2 %vm373_vm1, %v368_v26 }
  0xb2   : > { %1761 = vmatmul.msk.f32.gmra.mxu0 %vm373_vm1, %v353_v27 }
  0xb3   : > { %1777 = vmatmul.msk.f32.gmra.mxu2 %vm373_vm1, %v369_v28  ;;  %v2500_v28 = vld [vmem:[#allocation2 + $0x30] sm:$0xff] }
  0xba   : > { %1762 = vmatmul.msk.f32.gmra.mxu0 %vm373_vm1, %v354_v29 }
  0xbb   : > { %1778 = vmatmul.msk.f32.gmra.mxu2 %vm373_vm1, %v370_v30 }
  0xc2   : > { %1763 = vmatmul.msk.f32.gmra.mxu0 %vm373_vm1, %v355_v31 }
  0xc3   : > { %1779 = vmatmul.msk.f32.gmra.mxu2 %vm373_vm1, %v371_v32  ;;  %v2513_v32 = vld [vmem:[#allocation2 + $0x38] sm:$0xff] }
  0xca   : > { %1764 = vmatmul.msk.f32.gmra.mxu0 %vm373_vm1, %v356_v33 }
  0xcb   : > { %1780 = vmatmul.msk.f32.gmra.mxu2 %vm373_vm1, %v372_v34 }
  0xcf   : > { %v2367_v35 = vpop.f32.mrf.mxu0 }
  0xd0   : > { %599 = vmax.xlane.f32.xlu0 %v2367_v35 }
  0xd6   : > { %v2370_v36 = vpop.f32.mrf.mxu2 }
  0xd7   : > { %v2372_v37 = vpop.f32.mrf.mxu0 }
  0xd8   : > { %601 = vmax.xlane.f32.xlu0 %v2372_v37 }
  0xde   : > { %v2375_v38 = vpop.f32.mrf.mxu2 }
  0xdf   : > { %v2377_v39 = vpop.f32.mrf.mxu0 }
  0xe0   : > { %603 = vmax.xlane.f32.xlu1 %v2377_v39 }
  0xe6   : > { %v2380_v40 = vpop.f32.mrf.mxu2 }
  0xe7   : > { %v2382_v41 = vpop.f32.mrf.mxu0 }
  0xe8   : > { %605 = vmax.xlane.f32.xlu1 %v2382_v41 }
  0xee   : > { %v2385_v42 = vpop.f32.mrf.mxu2 }
  0xef   : > { %v2387_v43 = vpop.f32.mrf.mxu0 }
  0xf0   : > { %607 = vmax.xlane.f32.xlu2 %v2387_v43 }
  0xf6   : > { %v2390_v44 = vpop.f32.mrf.mxu2 }
  0xf7   : > { %v2392_v45 = vpop.f32.mrf.mxu0 }
  0xf8   : > { %609 = vmax.xlane.f32.xlu2 %v2392_v45 }
  0xfe   : > { %v2395_v46 = vpop.f32.mrf.mxu2 }
  0xff   : > { %v2397_v47 = vpop.f32.mrf.mxu0 }
 0x100   : > { %611 = vmax.xlane.f32.xlu0 %v2397_v47 }
 0x106   : > { %v2400_v48 = vpop.f32.mrf.mxu2 }
 0x107   : > { %v2402_v49 = vpop.f32.mrf.mxu0 }
 0x108   : > { %613 = vmax.xlane.f32.xlu1 %v2402_v49 }
 0x10e   : > { %v2405_v50 = vpop.f32.mrf.mxu2 }
 0x10f   : > { %v2407_v51 = vpop.f32.mrf.mxu0 }
 0x110   : > { %615 = vmax.xlane.f32.xlu2 %v2407_v51 }
 0x116   : > { %v2410_v52 = vpop.f32.mrf.mxu2 }
 0x117   : > { %v2412_v53 = vpop.f32.mrf.mxu0 }
 0x118   : > { %617 = vmax.xlane.f32.xlu0 %v2412_v53 }
 0x11e   : > { %v2415_v54 = vpop.f32.mrf.mxu2 }
 0x11f   : > { %v2417_v55 = vpop.f32.mrf.mxu0 }
 0x120   : > { %619 = vmax.xlane.f32.xlu1 %v2417_v55 }
 0x126   : > { %v565_v56 = vpop.f32.mrf.mxu2 }
 0x127   : > { %v2420_v57 = vpop.f32.mrf.mxu0 }
 0x128   : > { %621 = vmax.xlane.f32.xlu2 %v2420_v57 }
 0x12e   : > { %v568_v58 = vpop.f32.mrf.mxu2 }
 0x12f   : > { %v2423_v59 = vpop.f32.mrf.mxu0 }
 0x130   : > { %623 = vmax.xlane.f32.xlu0 %v2423_v59 }
 0x136   : > { %v571_v61 = vpop.f32.mrf.mxu2 }
 0x137   : > { %v2426_v62 = vpop.f32.mrf.mxu0 }
 0x138   : > { %625 = vmax.xlane.f32.xlu1 %v2426_v62 }
 0x13e   : > { %v574_v63 = vpop.f32.mrf.mxu2 }
 0x13f   : > { %v2429_v0 = vpop.f32.mrf.mxu0 }
 0x140   : > { %627 = vmax.xlane.f32.xlu2 %v2429_v0 }
 0x143   : > { %v600_v2 = vpop.xlane.xlu0 %599 }
 0x144   : > { %v2435_v3 = vmax.f32 %v2432_v1, %v600_v2 }
 0x146   : > { %v577_v4 = vpop.f32.mrf.mxu2  ;;  %v647_v5 = vsub.f32 %v2432_v1, %v2435_v3  ;;  %1129 = vst.msk [vmem:[#allocation2] sm:$0xff] %vm903_vm2, %v2435_v3 }
 0x147   : > { %v2441_v6 = vpop.f32.mrf.mxu0 }
 0x148   : > { %629 = vmax.xlane.f32.xlu0 %v2441_v6 }
 0x14b   : > { %v602_v8 = vpop.xlane.xlu0 %601 }
 0x14c   : > { %v2447_v9 = vmax.f32 %v2444_v7, %v602_v8  ;;  %v2568_v8 = vld [vmem:[#allocation2 + $0x68] sm:$0xff] }
 0x14e   : > { %v580_v10 = vpop.f32.mrf.mxu2  ;;  %v648_v11 = vsub.f32 %v2444_v7, %v2447_v9  ;;  %1130 = vst.msk [vmem:[#allocation2 + $0x8] sm:$0xff] %vm903_vm2, %v2447_v9 }
 0x14f   : > { %1032 = vmatpush.xpose.msra.mxu1 %v580_v10  ;;  %1791 = vmatpush.xpose.msra.mxu3 %v580_v10 }
 0x151   : > { %697 = vperm.xlu1 %1883, %v2435_v3  }
 0x153   : > { %1033 = vmatpush.xpose.msra.mxu1 %v577_v4  ;;  %1792 = vmatpush.xpose.msra.mxu3 %v577_v4  ;;  %v604_v13 = vpop.xlane.xlu1 %603 }
 0x154   : > { %v2457_v14 = vmax.f32 %v2454_v12, %v604_v13 }
 0x156   : > { %v649_v15 = vsub.f32 %v2454_v12, %v2457_v14  ;;  %1131 = vst.msk [vmem:[#allocation2 + $0x10] sm:$0xff] %vm903_vm2, %v2457_v14 }
 0x157   : > { %1034 = vmatpush.xpose.msra.mxu1 %v574_v63  ;;  %1793 = vmatpush.xpose.msra.mxu3 %v574_v63  ;;  %v2559_v63 = vld [vmem:[#allocation2 + $0x60] sm:$0xff] }
 0x158   : > { %702 = vperm.xlu2 %1884, %v2447_v9   ;;  %v667_v7 = vmul.f32 1.442695, %v649_v15 }
 0x15b   : > { %1035 = vmatpush.xpose.msra.mxu1 %v571_v61  ;;  %1794 = vmatpush.xpose.msra.mxu3 %v571_v61  ;;  %v606_v17 = vpop.xlane.xlu1 %605 }
 0x15c   : > { %v2467_v18 = vmax.f32 %v2464_v16, %v606_v17  ;;  %707 = vperm.xlu0 %1885, %v2457_v14  }
 0x15e   : > { %v650_v19 = vsub.f32 %v2464_v16, %v2467_v18  ;;  %1132 = vst.msk [vmem:[#allocation2 + $0x18] sm:$0xff] %vm903_vm2, %v2467_v18 }
 0x15f   : > { %1036 = vmatpush.xpose.msra.mxu1 %v568_v58  ;;  %1795 = vmatpush.xpose.msra.mxu3 %v568_v58 }
 0x160   : > { %712 = vperm.xlu2 %1884, %v2467_v18   ;;  %v669_v1 = vmul.f32 1.442695, %v650_v19 }
 0x163   : > { %1037 = vmatpush.xpose.msra.mxu1 %v565_v56  ;;  %1796 = vmatpush.xpose.msra.mxu3 %v565_v56  ;;  %v608_v21 = vpop.xlane.xlu2 %607  ;;  %v2546_v56 = vld [vmem:[#allocation2 + $0x50] sm:$0xff] }
 0x164   : > { %v2478_v22 = vmax.f32 %v2475_v20, %v608_v21  ;;  %v2578_v21 = vld [vmem:[#allocation2 + $0x70] sm:$0xff] }
 0x166   : > { %v651_v23 = vsub.f32 %v2475_v20, %v2478_v22  ;;  %1133 = vst.msk [vmem:[#allocation2 + $0x20] sm:$0xff] %vm903_vm2, %v2478_v22  ;;  %717 = vperm.xlu1 %1883, %v2478_v22  }
 0x167   : > { %1038 = vmatpush.xpose.msra.mxu1 %v2415_v54  ;;  %1797 = vmatpush.xpose.msra.mxu3 %v2415_v54 }
 0x168   : > { %v671_v3 = vmul.f32 1.442695, %v651_v23 }
 0x16b   : > { %1039 = vmatpush.xpose.msra.mxu1 %v2410_v52  ;;  %1798 = vmatpush.xpose.msra.mxu3 %v2410_v52  ;;  %v610_v25 = vpop.xlane.xlu2 %609  ;;  %v2534_v52 = vld [vmem:[#allocation2 + $0x48] sm:$0xff] }
 0x16c   : > { %v2492_v26 = vmax.f32 %v2487_v24, %v610_v25  ;;  %v665_v25 = vmul.f32 1.442695, %v648_v11 }
 0x16e   : > { %v652_v27 = vsub.f32 %v2487_v24, %v2492_v26  ;;  %1134 = vst.msk [vmem:[#allocation2 + $0x28] sm:$0xff] %vm903_vm2, %v2492_v26  ;;  %1886 = vpow2.f32 %v665_v25 }
 0x16f   : > { %1040 = vmatpush.xpose.msra.mxu1 %v2405_v50  ;;  %1799 = vmatpush.xpose.msra.mxu3 %v2405_v50  ;;  %1888 = vpow2.f32 %v667_v7 }
 0x170   : > { %v673_v9 = vmul.f32 1.442695, %v652_v27 }
 0x172   : > { %1890 = vpow2.f32 %v673_v9 }
 0x173   : > { %1041 = vmatpush.xpose.msra.mxu1 %v2400_v48  ;;  %1800 = vmatpush.xpose.msra.mxu3 %v2400_v48  ;;  %v612_v29 = vpop.xlane.xlu0 %611 }
 0x174   : > { %v2505_v30 = vmax.f32 %v2500_v28, %v612_v29 }
 0x176   : > { %v653_v31 = vsub.f32 %v2500_v28, %v2505_v30  ;;  %1135 = vst.msk [vmem:[#allocation2 + $0x30] sm:$0xff] %vm903_vm2, %v2505_v30 }
 0x177   : > { %1042 = vmatpush.xpose.msra.mxu1 %v2395_v46  ;;  %1801 = vmatpush.xpose.msra.mxu3 %v2395_v46  ;;  %v2526_v46 = vld [vmem:[#allocation2 + $0x40] sm:$0xff] }
 0x17b   : > { %1043 = vmatpush.xpose.msra.mxu1 %v2390_v44  ;;  %1802 = vmatpush.xpose.msra.mxu3 %v2390_v44  ;;  %v614_v33 = vpop.xlane.xlu1 %613 }
 0x17c   : > { %v2518_v34 = vmax.f32 %v2513_v32, %v614_v33 }
 0x17e   : > { %v654_v48 = vsub.f32 %v2513_v32, %v2518_v34  ;;  %1136 = vst.msk [vmem:[#allocation2 + $0x38] sm:$0xff] %vm903_vm2, %v2518_v34 }
 0x17f   : > { %1044 = vmatpush.xpose.msra.mxu1 %v2385_v42  ;;  %1803 = vmatpush.xpose.msra.mxu3 %v2385_v42 }
 0x180   : > { %v677_v19 = vmul.f32 1.442695, %v654_v48 }
 0x183   : > { %1045 = vmatpush.xpose.msra.mxu1 %v2380_v40  ;;  %1804 = vmatpush.xpose.msra.mxu3 %v2380_v40  ;;  %v616_v44 = vpop.xlane.xlu2 %615 }
 0x184   : > { %v639_v50 = vmax.f32 %v2526_v46, %v616_v44 }
 0x186   : > { %1137 = vst.msk [vmem:[#allocation2 + $0x40] sm:$0xff] %vm903_vm2, %v639_v50  ;;  %v655_v12 = vsub.f32 %v2526_v46, %v639_v50 }
 0x187   : > { %1046 = vmatpush.xpose.msra.mxu1 %v2375_v38  ;;  %1805 = vmatpush.xpose.msra.mxu3 %v2375_v38 }
 0x18b   : > { %1047 = vmatpush.xpose.msra.mxu1 %v2370_v36  ;;  %1806 = vmatpush.xpose.msra.mxu3 %v2370_v36  ;;  %v618_v42 = vpop.xlane.xlu0 %617  ;;  %v2555_v36 = vld [vmem:[#allocation2 + $0x58] sm:$0xff] }
 0x18c   : > { %v2539_v54 = vmax.f32 %v2534_v52, %v618_v42  ;;  %v2592_v42 = vld [vmem:[#allocation2 + $0x78] sm:$0xff] }
 0x18e   : > { %v656_v40 = vsub.f32 %v2534_v52, %v2539_v54  ;;  %1138 = vst.msk [vmem:[#allocation2 + $0x48] sm:$0xff] %vm903_vm2, %v2539_v54  ;;  %742 = vperm.xlu2 %1884, %v2539_v54  }
 0x193   : > { %v620_v38 = vpop.xlane.xlu1 %619 }
 0x194   : > { %v2549_v58 = vmax.f32 %v2546_v56, %v620_v38  ;;  %v663_v38 = vmul.f32 1.442695, %v647_v5  ;;  %v679_v5 = vmul.f32 1.442695, %v655_v12 }
 0x196   : > { %1139 = vst.msk [vmem:[#allocation2 + $0x50] sm:$0xff] %vm903_vm2, %v2549_v58  ;;  %747 = vperm.xlu1 %1883, %v2549_v58   ;;  %722 = vperm.xlu2 %1884, %v2492_v26   ;;  %1892 = vpow2.f32 %v663_v38  ;;  %v657_v28 = vsub.f32 %v2546_v56, %v2549_v58 }
 0x197   : > { %1894 = vpow2.f32 %v669_v1 }
 0x198   : > { %1896 = vpow2.f32 %v671_v3 }
 0x199   : > { %1898 = vpow2.f32 %v679_v5 }
 0x19b   : > { %v622_v60 = vpop.xlane.xlu2 %621 }
 0x19c   : > { %v642_v61 = vmax.f32 %v2555_v36, %v622_v60 }
 0x19e   : > { %1140 = vst.msk [vmem:[#allocation2 + $0x58] sm:$0xff] %vm903_vm2, %v642_v61  ;;  %752 = vperm.xlu1 %1883, %v642_v61   ;;  %v658_v16 = vsub.f32 %v2555_v36, %v642_v61 }
 0x1a0   : > { %v685_v22 = vmul.f32 1.442695, %v658_v16 }
 0x1a3   : > { %v624_v2 = vpop.xlane.xlu0 %623 }
 0x1a4   : > { %v2562_v4 = vmax.f32 %v2559_v63, %v624_v2  ;;  %v2606_v2 = vpop.eup %1886 }
 0x1a5   : > { %v2621_v15 = vpop.eup %1888 }
 0x1a6   : > { %1141 = vst.msk [vmem:[#allocation2 + $0x60] sm:$0xff] %vm903_vm2, %v2562_v4  ;;  %727 = vperm.xlu1 %1883, %v2505_v30   ;;  %757 = vperm.xlu0 %1885, %v2562_v4   ;;  %v2624_v26 = vpop.eup %1890 }
 0x1a7   : > { %v2626_v46 = vpop.eup %1892 }
 0x1a8   : > { %v2639_v20 = vpop.eup %1894 }
 0x1a9   : > { %v2641_v23 = vpop.eup %1896 }
 0x1aa   : > { %v2643_v36 = vpop.eup %1898 }
 0x1ab   : > { %v626_v10 = vpop.xlane.xlu1 %625 }
 0x1ac   : > { %v2571_v13 = vmax.f32 %v2568_v8, %v626_v10 }
 0x1ae   : > { %v660_v17 = vsub.f32 %v2568_v8, %v2571_v13  ;;  %1142 = vst.msk [vmem:[#allocation2 + $0x68] sm:$0xff] %vm903_vm2, %v2571_v13  ;;  %762 = vperm.xlu2 %1884, %v2571_v13  }
 0x1b3   : > { %v628_v29 = vpop.xlane.xlu2 %627 }
 0x1b4   : > { %v2584_v33 = vmax.f32 %v2578_v21, %v628_v29 }
 0x1b6   : > { %v661_v44 = vsub.f32 %v2578_v21, %v2584_v33  ;;  %1143 = vst.msk [vmem:[#allocation2 + $0x70] sm:$0xff] %vm903_vm2, %v2584_v33  ;;  %732 = vperm.xlu2 %1884, %v2518_v34   ;;  %767 = vperm.xlu0 %1885, %v2584_v33   ;;  %v683_v34 = vmul.f32 1.442695, %v657_v28  ;;  %v924_v21 = vld [vmem:[#allocation4 + $0x50] sm:$0xff] }
 0x1bb   : > { %v630_v11 = vpop.xlane.xlu0 %629  ;;  %v703_v27 = vpop.permute.xlu2 %702 }
 0x1bc   : > { %v2604_v60 = vmax.f32 %v2592_v42, %v630_v11  ;;  %v776_v18 = vsub.f32 %v2372_v37, %v703_v27 }
 0x1be   : > { %v662_v10 = vsub.f32 %v2592_v42, %v2604_v60  ;;  %1144 = vst.msk [vmem:[#allocation2 + $0x78] sm:$0xff] %vm903_vm2, %v2604_v60  ;;  %943 = vperm.xlu2 %1884, %v2606_v2   ;;  %737 = vperm.xlu0 %1885, %v639_v50   ;;  %v793_v25 = vmul.f32 1.442695, %v776_v18 }
 0x1bf   : > { %772 = vperm.xlu1 %1883, %v2604_v60   ;;  %v921_v60 = vld [vmem:[#allocation4] sm:$0xff] }
 0x1c3   : > { %v698_v14 = vpop.permute.xlu1 %697  ;;  %v713_v56 = vpop.permute.xlu2 %712 }
 0x1c4   : > { %v775_v24 = vsub.f32 %v2367_v35, %v698_v14  ;;  %v675_v35 = vmul.f32 1.442695, %v653_v31  ;;  %v681_v31 = vmul.f32 1.442695, %v656_v40  ;;  %v778_v52 = vsub.f32 %v2382_v41, %v713_v56 }
 0x1c6   : > { %v791_v50 = vmul.f32 1.442695, %v775_v24  ;;  %963 = vperm.xlu2 %1884, %v2624_v26   ;;  %948 = vperm.xlu0 %1885, %v2621_v15   ;;  %v797_v9 = vmul.f32 1.442695, %v778_v52 }
 0x1c7   : > { %938 = vperm.xlu1 %1883, %v2626_v46  }
 0x1c8   : > { %1900 = vpow2.f32 %v791_v50 }
 0x1c9   : > { %1902 = vpow2.f32 %v675_v35 }
 0x1ca   : > { %1904 = vpow2.f32 %v677_v19 }
 0x1cb   : > { %1906 = vpow2.f32 %v685_v22 }
 0x1cc   : > { %1908 = vpow2.f32 %v793_v25 }
 0x1cd   : > { %1910 = vpow2.f32 %v681_v31 }
 0x1ce   : > { %v1901_v61 = vpop.eup %1900  ;;  %978 = vperm.xlu2 %1884, %v2643_v36   ;;  %958 = vperm.xlu0 %1885, %v2641_v23   ;;  %v708_v37 = vpop.permute.xlu0 %707  ;;  %1912 = vpow2.f32 %v683_v34 }
 0x1cf   : > { %953 = vperm.xlu1 %1883, %v2639_v20   ;;  %1048 = vmatmul.f32.vlgmr.msra.gmra.mxu1 %v1901_v61  ;;  %v777_v30 = vsub.f32 %v2377_v39, %v708_v37  ;;  %v2654_v32 = vpop.eup %1902  ;;  %v659_v39 = vsub.f32 %v2559_v63, %v2562_v4 }
 0x1d0   : > { %v2656_v48 = vpop.eup %1904 }
 0x1d1   : > { %v795_v29 = vmul.f32 1.442695, %v777_v30  ;;  %v2658_v7 = vpop.eup %1906  ;;  %v687_v54 = vmul.f32 1.442695, %v659_v39 }
 0x1d2   : > { %v1909_v58 = vpop.eup %1908 }
 0x1d3   : > { %1914 = vpow2.f32 %v795_v29  ;;  %v2666_v40 = vpop.eup %1910 }
 0x1d4   : > { %v2668_v11 = vpop.eup %1912  ;;  %1916 = vpow2.f32 %v687_v54 }
 0x1d5   : > { %1918 = vpow2.f32 %v797_v9 }
 0x1d6   : > { %993 = vperm.xlu2 %1884, %v2658_v7   ;;  %973 = vperm.xlu0 %1885, %v2656_v48  }
 0x1d7   : > { %968 = vperm.xlu1 %1883, %v2654_v32   ;;  %1051 = vmatmul.f32.gmra.mxu1 %v1909_v58 }
 0x1d8   : > { %v718_v38 = vpop.permute.xlu1 %717 }
 0x1d9   : > { %v1915_v12 = vpop.eup %1914  ;;  %v779_v63 = vsub.f32 %v2387_v43, %v718_v38 }
 0x1da   : > { %v2673_v41 = vpop.eup %1916 }
 0x1db   : > { %v799_v4 = vmul.f32 1.442695, %v779_v63  ;;  %v1919_v1 = vpop.eup %1918 }
 0x1dd   : > { %1920 = vpow2.f32 %v799_v4 }
 0x1de   : > { %988 = vperm.xlu0 %1885, %v2668_v11  }
 0x1df   : > { %983 = vperm.xlu1 %1883, %v2666_v40   ;;  %1054 = vmatmul.f32.gmra.mxu1 %v1915_v12 }
 0x1e3   : > { %v1921_v24 = vpop.eup %1920 }
 0x1e7   : > { %998 = vperm.xlu1 %1883, %v2673_v41   ;;  %1057 = vmatmul.f32.gmra.mxu1 %v1919_v1 }
 0x1e8   : > { %v743_v3 = vpop.permute.xlu2 %742 }
 0x1e9   : > { %v784_v5 = vsub.f32 %v2412_v53, %v743_v3 }
 0x1eb   : > { %v809_v14 = vmul.f32 1.442695, %v784_v5 }
 0x1ed   : > { %1922 = vpow2.f32 %v809_v14 }
 0x1ef   : > { %1060 = vmatmul.f32.gmra.mxu1 %v1921_v24 }
 0x1f0   : > { %v723_v27 = vpop.permute.xlu2 %722 }
 0x1f1   : > { %v780_v50 = vsub.f32 %v2392_v45, %v723_v27 }
 0x1f3   : > { %v1923_v16 = vpop.eup %1922  ;;  %v801_v43 = vmul.f32 1.442695, %v780_v50  ;;  %v693_v50 = vmul.f32 1.442695, %v662_v10 }
 0x1f4   : > { %1075 = vmatmul.f32.vlgmr.msra.gmra.mxu3 %v1923_v16 }
 0x1f5   : > { %1924 = vpow2.f32 %v801_v43 }
 0x1fb   : > { %v1925_v18 = vpop.eup %1924 }
 0x1fc   : > { %1063 = vmatmul.f32.gmra.mxu1 %v1925_v18 }
 0x1ff   : > { %855 = vadd.xlane.f32.xlu2 %v1901_v61 }
 0x207   : > { %861 = vadd.xlane.f32.xlu2 %v1919_v1 }
 0x208   : > { %v748_v35 = vpop.permute.xlu1 %747  ;;  %v763_v19 = vpop.permute.xlu2 %762  ;;  %859 = vadd.xlane.f32.xlu0 %v1915_v12 }
 0x209   : > { %v785_v53 = vsub.f32 %v2417_v55, %v748_v35 }
 0x20b   : > { %v811_v22 = vmul.f32 1.442695, %v785_v53 }
 0x20d   : > { %1926 = vpow2.f32 %v811_v22 }
 0x20f   : > { %865 = vadd.xlane.f32.xlu2 %v1925_v18 }
 0x210   : > { %v753_v25 = vpop.permute.xlu1 %752  ;;  %v733_v37 = vpop.permute.xlu2 %732 }
 0x211   : > { %v786_v45 = vsub.f32 %v2420_v57, %v753_v25  ;;  %857 = vadd.xlane.f32.xlu1 %v1909_v58  ;;  %v782_v28 = vsub.f32 %v2402_v49, %v733_v37  ;;  %v788_v49 = vsub.f32 %v2426_v62, %v763_v19  ;;  %v922_v25 = vld [vmem:[#allocation4 + $0x58] sm:$0xff]  ;;  %v691_v37 = vmul.f32 1.442695, %v661_v44 }
 0x213   : > { %v1927_v30 = vpop.eup %1926  ;;  %v813_v31 = vmul.f32 1.442695, %v786_v45  ;;  %v805_v61 = vmul.f32 1.442695, %v782_v28  ;;  %v817_v58 = vmul.f32 1.442695, %v788_v49 }
 0x214   : > { %1078 = vmatmul.f32.gmra.mxu3 %v1927_v30 }
 0x215   : > { %1928 = vpow2.f32 %v813_v31 }
 0x216   : > { %1930 = vpow2.f32 %v805_v61 }
 0x218   : > { %v728_v34 = vpop.permute.xlu1 %727  ;;  %v758_v55 = vpop.permute.xlu0 %757 }
 0x219   : > { %v781_v29 = vsub.f32 %v2397_v47, %v728_v34  ;;  %863 = vadd.xlane.f32.xlu1 %v1921_v24  ;;  %v787_v56 = vsub.f32 %v2423_v59, %v758_v55  ;;  %v944_v35 = vpop.permute.xlu2 %943 }
 0x21a   : > { %v1017_v8 = vmul.f32 %v944_v35, %v921_v60  ;;  %v824_v60 = vld [vmem:[#allocation3 + $0x8] sm:$0xff] }
 0x21b   : > { %v1929_v39 = vpop.eup %1928  ;;  %v803_v52 = vmul.f32 1.442695, %v781_v29  ;;  %v815_v54 = vmul.f32 1.442695, %v787_v56  ;;  %v923_v29 = vld [vmem:[#allocation4 + $0x18] sm:$0xff] }
 0x21c   : > { %1081 = vmatmul.f32.gmra.mxu3 %v1929_v39  ;;  %v1931_v57 = vpop.eup %1930 }
 0x21d   : > { %1932 = vpow2.f32 %v803_v52 }
 0x21e   : > { %1934 = vpow2.f32 %v815_v54 }
 0x21f   : > { %1936 = vpow2.f32 %v817_v58 }
 0x221   : > { %869 = vadd.xlane.f32.xlu1 %v1931_v57  ;;  %v964_v22 = vpop.permute.xlu2 %963 }
 0x223   : > { %v1933_v9 = vpop.eup %1932 }
 0x224   : > { %v1935_v38 = vpop.eup %1934  ;;  %867 = vadd.xlane.f32.xlu0 %v1933_v9  ;;  %1066 = vmatmul.f32.gmra.mxu1 %v1933_v9  ;;  %v823_v9 = vld [vmem:[#allocation3] sm:$0xff] }
 0x225   : > { %1084 = vmatmul.f32.gmra.mxu3 %v1935_v38  ;;  %v1937_v63 = vpop.eup %1936 }
 0x228   : > { %v768_v47 = vpop.permute.xlu0 %767 }
 0x229   : > { %875 = vadd.xlane.f32.xlu1 %v1927_v30  ;;  %v789_v59 = vsub.f32 %v2429_v0, %v768_v47  ;;  %v2702_v34 = vpop.permute.xlu2 %978 }
 0x22b   : > { %v819_v12 = vmul.f32 1.442695, %v789_v59 }
 0x22c   : > { %873 = vadd.xlane.f32.xlu0 %v1923_v16  ;;  %1069 = vmatmul.f32.gmra.mxu1 %v1931_v57 }
 0x22d   : > { %1938 = vpow2.f32 %v819_v12  ;;  %1087 = vmatmul.f32.gmra.mxu3 %v1937_v63  ;;  %v929_v12 = vld [vmem:[#allocation4 + $0x20] sm:$0xff] }
 0x230   : > { %v738_v62 = vpop.permute.xlu0 %737 }
 0x231   : > { %881 = vadd.xlane.f32.xlu1 %v1937_v63  ;;  %v773_v4 = vpop.permute.xlu1 %772  ;;  %v783_v1 = vsub.f32 %v2407_v51, %v738_v62  ;;  %v689_v51 = vmul.f32 1.442695, %v660_v17  ;;  %v2711_v54 = vpop.permute.xlu2 %993 }
 0x232   : > { %v790_v3 = vsub.f32 %v2441_v6, %v773_v4  ;;  %v920_v6 = vld [vmem:[#allocation4 + $0x30] sm:$0xff]  ;;  %v925_v4 = vld [vmem:[#allocation4 + $0x68] sm:$0xff] }
 0x233   : > { %v1939_v5 = vpop.eup %1938  ;;  %v807_v14 = vmul.f32 1.442695, %v783_v1 }
 0x234   : > { %v821_v24 = vmul.f32 1.442695, %v790_v3  ;;  %879 = vadd.xlane.f32.xlu0 %v1935_v38  ;;  %v839_v38 = vmul.f32 %v2626_v46, %v823_v9  ;;  %v826_v3 = vld [vmem:[#allocation3 + $0x18] sm:$0xff] }
 0x235   : > { %1940 = vpow2.f32 %v807_v14  ;;  %1090 = vmatmul.f32.gmra.mxu3 %v1939_v5  ;;  %v825_v14 = vld [vmem:[#allocation3 + $0x10] sm:$0xff] }
 0x236   : > { %1942 = vpow2.f32 %v821_v24  ;;  %v1021_v24 = vmul.f32 %v964_v22, %v925_v4  ;;  %v827_v22 = vld [vmem:[#allocation3 + $0x20] sm:$0xff] }
 0x237   : > { %1944 = vpow2.f32 %v693_v50  ;;  %v842_v50 = vmul.f32 %v2639_v20, %v826_v3  ;;  %v836_v3 = vld [vmem:[#allocation3 + $0x68] sm:$0xff] }
 0x238   : > { %1946 = vpow2.f32 %v689_v51  ;;  %v949_v17 = vpop.permute.xlu0 %948 }
 0x239   : > { %v939_v16 = vpop.permute.xlu1 %938  ;;  %v1018_v45 = vmul.f32 %v949_v17, %v922_v25  ;;  %1948 = vpow2.f32 %v691_v37  ;;  %v840_v17 = vmul.f32 %v2606_v2, %v824_v60  ;;  %v843_v25 = vmul.f32 %v2641_v23, %v827_v22  ;;  %v838_v60 = vld [vmem:[#allocation3 + $0x78] sm:$0xff] }
 0x23a   : > { %v1016_v18 = vmul.f32 %v939_v16, %v920_v6  ;;  %v841_v6 = vmul.f32 %v2621_v15, %v825_v14 }
 0x23b   : > { %v1941_v0 = vpop.eup %1940 }
 0x23c   : > { %v1943_v27 = vpop.eup %1942  ;;  %871 = vadd.xlane.f32.xlu2 %v1941_v0  ;;  %1072 = vmatmul.f32.gmra.mxu1 %v1941_v0 }
 0x23d   : > { %885 = vadd.xlane.f32.xlu0 %v1943_v27  ;;  %1093 = vmatmul.f32.gmra.mxu3 %v1943_v27  ;;  %v2693_v43 = vpop.eup %1944 }
 0x23e   : > { %v2696_v42 = vpop.eup %1946 }
 0x23f   : > { %v2704_v55 = vpop.eup %1948  ;;  %v852_v14 = vmul.f32 %v2696_v42, %v836_v3 }
 0x240   : > { %v959_v61 = vpop.permute.xlu0 %958 }
 0x241   : > { %v954_v31 = vpop.permute.xlu1 %953  ;;  %v1020_v49 = vmul.f32 %v959_v61, %v924_v21 }
 0x242   : > { %v1019_v56 = vmul.f32 %v954_v31, %v923_v29  ;;  %v829_v31 = vld [vmem:[#allocation3 + $0x30] sm:$0xff] }
 0x244   : > { %877 = vadd.xlane.f32.xlu2 %v1929_v39 }
 0x248   : > { %v2709_v44 = vpop.permute.xlu0 %973 }
 0x249   : > { %v2707_v33 = vpop.permute.xlu1 %968 }
 0x24a   : > { %1013 = vperm.xlu1 %1883, %v2693_v43  }
 0x24c   : > { %v1049_v19 = vpop.f32.mrf.mxu1  ;;  %883 = vadd.xlane.f32.xlu2 %v1939_v5 }
 0x24d   : > { %v1097_v53 = vadd.f32 %v1049_v19, %v1016_v18 }
 0x24f   : > { %1113 = vst [vmem:[#allocation4 + $0x30] sm:$0xff] %v1097_v53  ;;  %v828_v53 = vld [vmem:[#allocation3 + $0x28] sm:$0xff] }
 0x250   : > { %v989_v63 = vpop.permute.xlu0 %988 }
 0x251   : > { %1003 = vperm.xlu0 %1885, %v2696_v42   ;;  %v984_v47 = vpop.permute.xlu1 %983 }
 0x252   : > { %v1025_v1 = vmul.f32 %v984_v47, %v929_v12 }
 0x254   : > { %v1052_v13 = vpop.f32.mrf.mxu1 }
 0x255   : > { %v1098_v10 = vadd.f32 %v1052_v13, %v1017_v8  ;;  %v844_v8 = vmul.f32 %v2624_v26, %v828_v53  ;;  %v831_v53 = vld [vmem:[#allocation3 + $0x40] sm:$0xff] }
 0x257   : > { %1114 = vst [vmem:[#allocation4] sm:$0xff] %v1098_v10 }
 0x259   : > { %v2717_v35 = vpop.permute.xlu1 %998 }
 0x25c   : > { %v1055_v28 = vpop.f32.mrf.mxu1 }
 0x25d   : > { %v1099_v30 = vadd.f32 %v1055_v28, %v1018_v45  ;;  %v830_v28 = vld [vmem:[#allocation3 + $0x38] sm:$0xff] }
 0x25e   : > { %v846_v26 = vmul.f32 %v2656_v48, %v830_v28  ;;  %v832_v48 = vld [vmem:[#allocation3 + $0x48] sm:$0xff] }
 0x25f   : > { %1115 = vst [vmem:[#allocation4 + $0x58] sm:$0xff] %v1099_v30  ;;  %v930_v30 = vld [vmem:[#allocation4 + $0x10] sm:$0xff] }
 0x260   : > { %v1026_v29 = vmul.f32 %v989_v63, %v930_v30  ;;  %v837_v30 = vld [vmem:[#allocation3 + $0x70] sm:$0xff] }
 0x264   : > { %v1058_v39 = vpop.f32.mrf.mxu1  ;;  %1008 = vperm.xlu2 %1884, %v2704_v55  }
 0x265   : > { %v1100_v52 = vadd.f32 %v1058_v39, %v1019_v56  ;;  %v845_v56 = vmul.f32 %v2654_v32, %v829_v31  ;;  %v848_v32 = vmul.f32 %v2666_v40, %v832_v48 }
 0x267   : > { %1116 = vst [vmem:[#allocation4 + $0x18] sm:$0xff] %v1100_v52 }
 0x26c   : > { %v1061_v57 = vpop.f32.mrf.mxu1 }
 0x26d   : > { %v1101_v58 = vadd.f32 %v1061_v57, %v1020_v49  ;;  %v833_v49 = vld [vmem:[#allocation3 + $0x50] sm:$0xff]  ;;  %v931_v57 = vld [vmem:[#allocation4 + $0x38] sm:$0xff] }
 0x26f   : > { %1117 = vst [vmem:[#allocation4 + $0x50] sm:$0xff] %v1101_v58  ;;  %v849_v58 = vmul.f32 %v2668_v11, %v833_v49 }
 0x272   : > { %v856_v59 = vpop.xlane.xlu2 %855 }
 0x273   : > { %v887_v62 = vadd.f32 %v856_v59, %v839_v38  ;;  %v926_v38 = vld [vmem:[#allocation4 + $0x8] sm:$0xff]  ;;  %v1027_v59 = vmul.f32 %v2711_v54, %v931_v57  ;;  %v932_v54 = vld [vmem:[#allocation4 + $0x60] sm:$0xff] }
 0x275   : > { %904 = vst.msk [vmem:[#allocation3] sm:$0xff] %vm903_vm2, %v887_v62  ;;  %v1022_v62 = vmul.f32 %v2707_v33, %v926_v38  ;;  %v1028_v33 = vmul.f32 %v2717_v35, %v932_v54  ;;  %v854_v35 = vmul.f32 %v2693_v43, %v838_v60 }
 0x277   : > { %v1076_v5 = vpop.f32.mrf.mxu3 }
 0x278   : > { %v1106_v0 = vadd.f32 %v1076_v5, %v1025_v1 }
 0x279   : > { %v1064_v27 = vpop.f32.mrf.mxu1 }
 0x27a   : > { %1122 = vst [vmem:[#allocation4 + $0x20] sm:$0xff] %v1106_v0  ;;  %v1102_v51 = vadd.f32 %v1064_v27, %v1021_v24  ;;  %v862_v46 = vpop.xlane.xlu2 %861  ;;  %v835_v24 = vld [vmem:[#allocation3 + $0x60] sm:$0xff]  ;;  %v927_v0 = vld [vmem:[#allocation4 + $0x48] sm:$0xff] }
 0x27b   : > { %v890_v16 = vadd.f32 %v862_v46, %v842_v50  ;;  %v860_v18 = vpop.xlane.xlu0 %859  ;;  %v851_v50 = vmul.f32 %v2673_v41, %v835_v24  ;;  %v1023_v46 = vmul.f32 %v2709_v44, %v927_v0  ;;  %v847_v41 = vmul.f32 %v2643_v36, %v831_v53 }
 0x27c   : > { %1118 = vst [vmem:[#allocation4 + $0x68] sm:$0xff] %v1102_v51  ;;  %v889_v19 = vadd.f32 %v860_v18, %v841_v6 }
 0x27d   : > { %907 = vst.msk [vmem:[#allocation3 + $0x18] sm:$0xff] %vm903_vm2, %v890_v16 }
 0x27e   : > { %906 = vst.msk [vmem:[#allocation3 + $0x10] sm:$0xff] %vm903_vm2, %v889_v19 }
 0x282   : > { %v866_v20 = vpop.xlane.xlu2 %865 }
 0x283   : > { %v892_v13 = vadd.f32 %v866_v20, %v844_v8 }
 0x284   : > { %v858_v10 = vpop.xlane.xlu1 %857 }
 0x285   : > { %909 = vst.msk [vmem:[#allocation3 + $0x28] sm:$0xff] %vm903_vm2, %v892_v13  ;;  %v888_v15 = vadd.f32 %v858_v10, %v840_v17  ;;  %v834_v10 = vld [vmem:[#allocation3 + $0x58] sm:$0xff] }
 0x286   : > { %v850_v22 = vmul.f32 %v2658_v7, %v834_v10 }
 0x287   : > { %905 = vst.msk [vmem:[#allocation3 + $0x8] sm:$0xff] %vm903_vm2, %v888_v15  ;;  %v928_v15 = vld [vmem:[#allocation4 + $0x40] sm:$0xff] }
 0x28c   : > { %v864_v37 = vpop.xlane.xlu1 %863 }
 0x28d   : > { %v891_v45 = vadd.f32 %v864_v37, %v843_v25  ;;  %v1024_v37 = vmul.f32 %v2702_v34, %v928_v15 }
 0x28f   : > { %908 = vst.msk [vmem:[#allocation3 + $0x20] sm:$0xff] %vm903_vm2, %v891_v45 }
 0x294   : > { %v870_v61 = vpop.xlane.xlu1 %869 }
 0x295   : > { %v894_v2 = vadd.f32 %v870_v61, %v846_v26  ;;  %v935_v26 = vld [vmem:[#allocation4 + $0x28] sm:$0xff]  ;;  %v853_v61 = vmul.f32 %v2704_v55, %v837_v30 }
 0x297   : > { %911 = vst.msk [vmem:[#allocation3 + $0x38] sm:$0xff] %vm903_vm2, %v894_v2  ;;  %v1079_v39 = vpop.f32.mrf.mxu3  ;;  %v868_v52 = vpop.xlane.xlu0 %867 }
 0x298   : > { %v1107_v21 = vadd.f32 %v1079_v39, %v1026_v29  ;;  %v893_v23 = vadd.f32 %v868_v52, %v845_v56  ;;  %v933_v52 = vld [vmem:[#allocation4 + $0x70] sm:$0xff] }
 0x29a   : > { %1123 = vst [vmem:[#allocation4 + $0x10] sm:$0xff] %v1107_v21 }
 0x29b   : > { %910 = vst.msk [vmem:[#allocation3 + $0x30] sm:$0xff] %vm903_vm2, %v893_v23  ;;  %v934_v23 = vld [vmem:[#allocation4 + $0x78] sm:$0xff] }
 0x29c   : > { %v876_v9 = vpop.xlane.xlu1 %875 }
 0x29d   : > { %v897_v47 = vadd.f32 %v876_v9, %v849_v58 }
 0x29f   : > { %914 = vst.msk [vmem:[#allocation3 + $0x50] sm:$0xff] %vm903_vm2, %v897_v47  ;;  %v1082_v12 = vpop.f32.mrf.mxu3  ;;  %v874_v63 = vpop.xlane.xlu0 %873 }
 0x2a0   : > { %v1108_v4 = vadd.f32 %v1082_v12, %v1027_v59  ;;  %v896_v1 = vadd.f32 %v874_v63, %v848_v32 }
 0x2a1   : > { %v1067_v5 = vpop.f32.mrf.mxu1 }
 0x2a2   : > { %1124 = vst [vmem:[#allocation4 + $0x38] sm:$0xff] %v1108_v4  ;;  %v1103_v11 = vadd.f32 %v1067_v5, %v1022_v62 }
 0x2a3   : > { %913 = vst.msk [vmem:[#allocation3 + $0x48] sm:$0xff] %vm903_vm2, %v896_v1 }
 0x2a4   : > { %1119 = vst [vmem:[#allocation4 + $0x8] sm:$0xff] %v1103_v11  ;;  %v882_v40 = vpop.xlane.xlu1 %881 }
 0x2a5   : > { %v900_v27 = vadd.f32 %v882_v40, %v852_v14 }
 0x2a7   : > { %917 = vst.msk [vmem:[#allocation3 + $0x68] sm:$0xff] %vm903_vm2, %v900_v27  ;;  %v880_v51 = vpop.xlane.xlu0 %879 }
 0x2a8   : > { %v1085_v6 = vpop.f32.mrf.mxu3  ;;  %v899_v16 = vadd.f32 %v880_v51, %v851_v50 }
 0x2a9   : > { %v1109_v18 = vadd.f32 %v1085_v6, %v1028_v33  ;;  %v1070_v19 = vpop.f32.mrf.mxu1 }
 0x2aa   : > { %916 = vst.msk [vmem:[#allocation3 + $0x60] sm:$0xff] %vm903_vm2, %v899_v16  ;;  %v1104_v42 = vadd.f32 %v1070_v19, %v1023_v46 }
 0x2ab   : > { %1125 = vst [vmem:[#allocation4 + $0x60] sm:$0xff] %v1109_v18 }
 0x2ac   : > { %1120 = vst [vmem:[#allocation4 + $0x48] sm:$0xff] %v1104_v42 }
 0x2af   : > { %v872_v8 = vpop.xlane.xlu2 %871 }
 0x2b0   : > { %v1088_v20 = vpop.f32.mrf.mxu3  ;;  %v895_v13 = vadd.f32 %v872_v8, %v847_v41  ;;  %v886_v17 = vpop.xlane.xlu0 %885 }
 0x2b1   : > { %v902_v44 = vadd.f32 %v886_v17, %v854_v35 }
 0x2b2   : > { %912 = vst.msk [vmem:[#allocation3 + $0x40] sm:$0xff] %vm903_vm2, %v895_v13 }
 0x2b3   : > { %919 = vst.msk [vmem:[#allocation3 + $0x78] sm:$0xff] %vm903_vm2, %v902_v44 }
 0x2b7   : > { %v878_v25 = vpop.xlane.xlu2 %877 }
 0x2b8   : > { %v1091_v45 = vpop.f32.mrf.mxu3  ;;  %v898_v36 = vadd.f32 %v878_v25, %v850_v22 }
 0x2b9   : > { %v1073_v28 = vpop.f32.mrf.mxu1 }
 0x2ba   : > { %915 = vst.msk [vmem:[#allocation3 + $0x58] sm:$0xff] %vm903_vm2, %v898_v36  ;;  %v1105_v43 = vadd.f32 %v1073_v28, %v1024_v37 }
 0x2bc   : > { %1121 = vst [vmem:[#allocation4 + $0x40] sm:$0xff] %v1105_v43  ;;  %v1014_v31 = vpop.permute.xlu1 %1013 }
 0x2bd   : > { %v1031_v2 = vmul.f32 %v1014_v31, %v935_v26 }
 0x2bf   : > { %v884_v29 = vpop.xlane.xlu2 %883 }
 0x2c0   : > { %v1094_v56 = vpop.f32.mrf.mxu3  ;;  %v901_v39 = vadd.f32 %v884_v29, %v853_v61 }
 0x2c1   : > { %v1112_v7 = vadd.f32 %v1094_v56, %v1031_v2 }
 0x2c2   : > { %918 = vst.msk [vmem:[#allocation3 + $0x70] sm:$0xff] %vm903_vm2, %v901_v39 }
 0x2c3   : > { %1128 = vst [vmem:[#allocation4 + $0x28] sm:$0xff] %v1112_v7  ;;  %v1004_v34 = vpop.permute.xlu0 %1003 }
 0x2c4   : > { %v1029_v21 = vmul.f32 %v1004_v34, %v933_v52 }
 0x2c6   : > { %v1110_v49 = vadd.f32 %v1088_v20, %v1029_v21 }
 0x2c7   : > { %v1009_v57 = vpop.permute.xlu2 %1008 }
 0x2c8   : > { %1126 = vst [vmem:[#allocation4 + $0x70] sm:$0xff] %v1110_v49  ;;  %v1030_v58 = vmul.f32 %v1009_v57, %v934_v23 }
 0x2ca   : > { %v1111_v48 = vadd.f32 %v1091_v45, %v1030_v58 }
 0x2cc   : > { %1127 = vst [vmem:[#allocation4 + $0x78] sm:$0xff] %v1111_v48 }
 0x2cd PF: > { %p1145_p1 = scmp.eq.s32.totalorder %s2064_s24, 1 }
 0x2ce   : > { %v1165_v55 = vld [vmem:[#allocation3 + $0x78] sm:$0xff] (%p1145_p1)  ;;  %v2753_v9 = vld [vmem:[#allocation3 + $0x68] sm:$0xff] (%p1145_p1)  ;;  %v2755_v38 = vld [vmem:[#allocation3 + $0x70] sm:$0xff] (%p1145_p1)  ;;  %v2085_v47 = vmov (%p1145_p1), 0  }
 0x2cf   : > { %1149 = sbr.rel (!%p1145_p1) target bundleno = 1175 (0x497), region = 56  ;;  %1951 = vset.pattern.permute.xlu1 (%p1145_p1), %v2085_v47  ;;  %1950 = vset.pattern.permute.xlu0 (%p1145_p1), %v2085_v47  ;;  %1953 = vrcp.f32 (%p1145_p1), %v1165_v55  ;;  %v1400_v59 = vand.u32 (%p1145_p1), 2147483647, %v1165_v55  ;;  %v1402_v32 = vand.u32 (%p1145_p1), 2147483648, %v1165_v55  ;;  %v2758_v12 = vld [vmem:[#allocation3 + $0x60] sm:$0xff] (%p1145_p1)  ;;  %v1372_v62 = vand.u32 (%p1145_p1), 2147483648, %v2753_v9 }
 0x2d0   : > { %1955 = vrcp.f32 (%p1145_p1), %v2753_v9  ;;  %1952 = vset.pattern.permute.xlu2 (%p1145_p1), %v2085_v47  ;;  %v1370_v63 = vand.u32 (%p1145_p1), 2147483647, %v2753_v9  ;;  %v2763_v4 = vld [vmem:[#allocation3 + $0x58] sm:$0xff] (%p1145_p1)  ;;  %vm1396_vm3 = vweird.f32 (%p1145_p1), %v1165_v55  ;;  %vm1366_vm4 = vweird.f32 (%p1145_p1), %v2753_v9  ;;  %v2769_v5 = vld [vmem:[#allocation3 + $0x50] sm:$0xff] (%p1145_p1)  ;;  %v2787_v6 = vld [vmem:[#allocation3 + $0x48] sm:$0xff] (%p1145_p1) }
 0x2d1   : > { %1957 = vrcp.f32 (%p1145_p1), %v2755_v38  ;;  %v1387_v1 = vand.u32 (%p1145_p1), 2147483648, %v2755_v38  ;;  %v1357_v3 = vand.u32 (%p1145_p1), 2147483648, %v2758_v12  ;;  %vm2771_vm5 = vcmp.eq.f32.partialorder (%p1145_p1), %v1400_v59, 8.507059e+37  ;;  %v2877_v59 = vld [vmem:[#allocation3 + $0x40] sm:$0xff] (%p1145_p1)  ;;  %v2900_v11 = vld [vmem:[#allocation3 + $0x38] sm:$0xff] (%p1145_p1) }
 0x2d2   : > { %1959 = vrcp.f32 (%p1145_p1), %v2758_v12  ;;  %v1403_v14 = vor.u32 (%p1145_p1), 1.1754944e-38, %v1402_v32  ;;  %vm1381_vm6 = vweird.f32 (%p1145_p1), %v2755_v38  ;;  %vm2777_vm7 = vcmp.eq.f32.partialorder (%p1145_p1), %v1370_v63, 8.507059e+37 }
 0x2d3   : > { %1961 = vrcp.f32 (%p1145_p1), %v2763_v4  ;;  %v1373_v40 = vor.u32 (%p1145_p1), 1.1754944e-38, %v1372_v62  ;;  %v1385_v0 = vand.u32 (%p1145_p1), 2147483647, %v2755_v38  ;;  %vm1351_vm8 = vweird.f32 (%p1145_p1), %v2758_v12 }
 0x2d4   : > { %v1340_v27 = vand.u32 2147483647, %v2763_v4  ;;  %v1355_v51 = vand.u32 2147483647, %v2758_v12  ;;  %v1342_v46 = vand.u32 2147483648, %v2763_v4  ;;  %1963 = vrcp.f32 %v2769_v5 }
 0x2d5   : > { %v1954_v24 = vpop.eup %1953  ;;  %v2792_v19 = vor.u32 1.1754944e-38, %v1387_v1  ;;  %v2794_v42 = vor.u32 1.1754944e-38, %v1357_v3  ;;  %vm1336_vm9 = vweird.f32 %v2763_v4  ;;  %vm1321_vm11 = vweird.f32 %v2769_v5 }
 0x2d6   : > { %v1956_v50 = vpop.eup %1955  ;;  %v1392_v33 = vmul.f32 %v1954_v24, %v1165_v55  ;;  %vm1397_vm10 = vweird.f32 %v1954_v24  ;;  %vm2802_vm13 = vcmp.eq.f32.partialorder %v1340_v27, 8.507059e+37  ;;  %1965 = vrcp.f32 %v2787_v6 }
 0x2d7   : > { %v2789_v16 = vpop.eup %1957  ;;  %v1362_v18 = vmul.f32 %v1956_v50, %v2753_v9  ;;  %vm1367_vm12 = vweird.f32 %v1956_v50  ;;  %vm2807_vm14 = vcmp.eq.f32.partialorder %v1385_v0, 8.507059e+37  ;;  %vm2813_vm15 = vcmp.eq.f32.partialorder %v1355_v51, 8.507059e+37  ;;  %vm2819_vm0 = vmor %vm1396_vm3, %vm1397_vm10 }
 0x2d8   : > { %v1393_v53 = vsub.f32 1.0, %v1392_v33  ;;  %v1377_v60 = vmul.f32 %v2789_v16, %v2755_v38  ;;  %v2800_v41 = vpop.eup %1959  ;;  %v1343_v22 = vor.u32 1.1754944e-38, %v1342_v46  ;;  %vm1382_vm1 = vweird.f32 %v2789_v16  ;;  %vm2831_vm2 = vmor %vm1366_vm4, %vm1367_vm12 }
 0x2d9   : > { %v1363_v8 = vsub.f32 1.0, %v1362_v18  ;;  %v1962_v20 = vpop.eup %1961  ;;  %v1347_v10 = vmul.f32 %v2800_v41, %v2758_v12  ;;  %v1325_v36 = vand.u32 2147483647, %v2769_v5  ;;  %vm1352_vm3 = vweird.f32 %v2800_v41  ;;  %vm2846_vm4 = vmor %vm1381_vm6, %vm1382_vm1 }
 0x2da   : > { %v1394_v13 = vmul.f32 %v1954_v24, %v1393_v53  ;;  %v1378_v17 = vsub.f32 1.0, %v1377_v60  ;;  %v1332_v45 = vmul.f32 %v1962_v20, %v2763_v4  ;;  %v2826_v28 = vpop.eup %1963  ;;  %vm1337_vm10 = vweird.f32 %v1962_v20  ;;  %v2935_v60 = vld [vmem:[#allocation3 + $0x28] sm:$0xff] }
 0x2db   : > { %v1364_v37 = vmul.f32 %v1956_v50, %v1363_v8  ;;  %v1348_v31 = vsub.f32 1.0, %v1347_v10  ;;  %v1317_v29 = vmul.f32 %v2826_v28, %v2769_v5  ;;  %vm1322_vm12 = vweird.f32 %v2826_v28 }
 0x2dc   : > { %v1395_v43 = vadd.f32 %v1954_v24, %v1394_v13  ;;  %v1379_v26 = vmul.f32 %v2789_v16, %v1378_v17  ;;  %v1333_v2 = vsub.f32 1.0, %v1332_v45  ;;  %v2852_v34 = vpop.eup %1965  ;;  %v1327_v38 = vand.u32 2147483648, %v2769_v5 }
 0x2dd   : > { %v1365_v61 = vadd.f32 %v1956_v50, %v1364_v37  ;;  %v1349_v52 = vmul.f32 %v2800_v41, %v1348_v31  ;;  %v1318_v58 = vsub.f32 1.0, %v1317_v29  ;;  %v1302_v47 = vmul.f32 %v2852_v34, %v2787_v6 }
 0x2de   : > { %v1399_v56 = vsel %vm2819_vm0, %v1954_v24, %v1395_v43  ;;  %v1380_v39 = vadd.f32 %v2789_v16, %v1379_v26  ;;  %vm2860_vm0 = vmor %vm1351_vm8, %vm1352_vm3  ;;  %v1334_v57 = vmul.f32 %v1962_v20, %v1333_v2  ;;  %vm2880_vm6 = vcmp.eq.f32.partialorder %v1325_v36, 8.507059e+37  ;;  %v2967_v26 = vld [vmem:[#allocation3 + $0x18] sm:$0xff] }
 0x2df   : > { %v1404_v21 = vsel %vm2771_vm5, %v1403_v14, %v1399_v56  ;;  %v1369_v23 = vsel %vm2831_vm2, %v1956_v50, %v1365_v61  ;;  %v1350_v55 = vadd.f32 %v2800_v41, %v1349_v52  ;;  %vm2870_vm5 = vmor %vm1336_vm9, %vm1337_vm10  ;;  %v1319_v12 = vmul.f32 %v2826_v28, %v1318_v58  ;;  %v2911_v50 = vld [vmem:[#allocation3 + $0x30] sm:$0xff] }
 0x2e0   : > { %1499 = vperm.xlu0 %1950, %v1404_v21   ;;  %v1374_v48 = vsel %vm2777_vm7, %v1373_v40, %v1369_v23  ;;  %v1335_v32 = vadd.f32 %v1962_v20, %v1334_v57  ;;  %vm1306_vm7 = vweird.f32 %v2787_v6  ;;  %v1384_v62 = vsel %vm2846_vm4, %v2789_v16, %v1380_v39  ;;  %vm2895_vm8 = vmor %vm1321_vm11, %vm1322_vm12  ;;  %v2973_v52 = vld [vmem:[#allocation3 + $0x10] sm:$0xff] }
 0x2e1   : > { %1489 = vperm.xlu1 %1951, %v1374_v48   ;;  %v1354_v4 = vsel %vm2860_vm0, %v2800_v41, %v1350_v55  ;;  %v1303_v3 = vsub.f32 1.0, %v1302_v47  ;;  %vm1307_vm9 = vweird.f32 %v2852_v34  ;;  %v1320_v24 = vadd.f32 %v2826_v28, %v1319_v12 }
 0x2e2   : > { %v1339_v14 = vsel %vm2870_vm5, %v1962_v20, %v1335_v32  ;;  %v1312_v54 = vand.u32 2147483648, %v2787_v6  ;;  %1967 = vrcp.f32 %v2877_v59  ;;  %v1328_v40 = vor.u32 1.1754944e-38, %v1327_v38  ;;  %vm2926_vm11 = vmor %vm1306_vm7, %vm1307_vm9  ;;  %v2944_v20 = vld [vmem:[#allocation3 + $0x20] sm:$0xff] }
 0x2e3   : > { %v1344_v5 = vsel %vm2802_vm13, %v1343_v22, %v1339_v14  ;;  %v1304_v0 = vmul.f32 %v2852_v34, %v1303_v3  ;;  %v1310_v27 = vand.u32 2147483647, %v2787_v6  ;;  %v1389_v33 = vsel %vm2807_vm14, %v2792_v19, %v1384_v62 }
 0x2e4   : > { %v1359_v51 = vsel %vm2813_vm15, %v2794_v42, %v1354_v4  ;;  %1479 = vperm.xlu2 %1952, %v1344_v5   ;;  %v1324_v46 = vsel %vm2895_vm8, %v2826_v28, %v1320_v24  ;;  %1969 = vrcp.f32 %v2900_v11  ;;  %v1295_v19 = vand.u32 2147483647, %v2877_v59  ;;  %v1421_v4 = vld [vmem:[#allocation4 + $0x28] sm:$0xff] }
 0x2e5   : > { %v1305_v18 = vadd.f32 %v2852_v34, %v1304_v0  ;;  %v1297_v42 = vand.u32 2147483648, %v2877_v59  ;;  %v1280_v53 = vand.u32 2147483647, %v2900_v11  ;;  %v1313_v41 = vor.u32 1.1754944e-38, %v1312_v54 }
 0x2e6   : > { %v1282_v8 = vand.u32 2147483648, %v2900_v11  ;;  %1971 = vrcp.f32 %v2911_v50  ;;  %vm1311_vm13 = vcmp.eq.f32.partialorder %v1310_v27, 8.507059e+37  ;;  %vm1291_vm14 = vweird.f32 %v2877_v59 }
 0x2e7   : > { %v1309_v6 = vsel %vm2926_vm11, %v2852_v34, %v1305_v18  ;;  %v1265_v35 = vand.u32 2147483647, %v2911_v50  ;;  %v1329_v17 = vsel %vm2880_vm6, %v1328_v40, %v1324_v46  ;;  %vm1276_vm15 = vweird.f32 %v2900_v11  ;;  %v1151_v18 = vld [vmem:[#allocation3 + $0x8] sm:$0xff] }
 0x2e8   : > { %1494 = vperm.xlu0 %1950, %v1389_v33   ;;  %v1968_v13 = vpop.eup %1967  ;;  %v1267_v44 = vand.u32 2147483648, %v2911_v50  ;;  %1973 = vrcp.f32 %v2935_v60  ;;  %vm2952_vm1 = vcmp.eq.f32.partialorder %v1295_v19, 8.507059e+37  ;;  %v1298_v22 = vor.u32 1.1754944e-38, %v1297_v42 }
 0x2e9   : > { %1484 = vperm.xlu1 %1951, %v1359_v51   ;;  %v1287_v10 = vmul.f32 %v1968_v13, %v2877_v59  ;;  %vm2956_vm2 = vcmp.eq.f32.partialorder %v1280_v53, 8.507059e+37  ;;  %v1314_v45 = vsel %vm1311_vm13, %v1313_v41, %v1309_v6  ;;  %v1283_v36 = vor.u32 1.1754944e-38, %v1282_v8 }
 0x2ea   : > { %v1970_v37 = vpop.eup %1969  ;;  %vm1261_vm3 = vweird.f32 %v2911_v50  ;;  %1975 = vrcp.f32 %v2944_v20  ;;  %vm1292_vm10 = vweird.f32 %v1968_v13  ;;  %vm2963_vm4 = vcmp.eq.f32.partialorder %v1265_v35, 8.507059e+37 }
 0x2eb   : > { %v1288_v28 = vsub.f32 1.0, %v1287_v10  ;;  %v1272_v43 = vmul.f32 %v1970_v37, %v2900_v11  ;;  %v1268_v61 = vor.u32 1.1754944e-38, %v1267_v44  ;;  %vm1246_vm12 = vweird.f32 %v2935_v60  ;;  %vm2978_vm5 = vmor %vm1291_vm14, %vm1292_vm10 }
 0x2ec   : > { %v1972_v31 = vpop.eup %1971  ;;  %1474 = vperm.xlu2 %1952, %v1329_v17   ;;  %v1250_v2 = vand.u32 2147483647, %v2935_v60  ;;  %v1252_v29 = vand.u32 2147483648, %v2935_v60  ;;  %vm1277_vm0 = vweird.f32 %v1970_v37  ;;  %v1235_v23 = vand.u32 2147483647, %v2944_v20 }
 0x2ed   : > { %v1289_v56 = vmul.f32 %v1968_v13, %v1288_v28  ;;  %v1273_v39 = vsub.f32 1.0, %v1272_v43  ;;  %v1257_v7 = vmul.f32 %v1972_v31, %v2911_v50  ;;  %vm1262_vm6 = vweird.f32 %v1972_v31  ;;  %vm2989_vm7 = vmor %vm1276_vm15, %vm1277_vm0 }
 0x2ee   : > { %v1974_v34 = vpop.eup %1973  ;;  %v1237_v49 = vand.u32 2147483648, %v2944_v20  ;;  %1977 = vrcp.f32 %v2967_v26  ;;  %vm2993_vm9 = vcmp.eq.f32.partialorder %v1250_v2, 8.507059e+37  ;;  %vm1231_vm11 = vweird.f32 %v2944_v20  ;;  %vm3006_vm13 = vmor %vm1261_vm3, %vm1262_vm6 }
 0x2ef   : > { %v1290_v57 = vadd.f32 %v1968_v13, %v1289_v56  ;;  %v1274_v58 = vmul.f32 %v1970_v37, %v1273_v39  ;;  %v1258_v48 = vsub.f32 1.0, %v1257_v7  ;;  %v1242_v55 = vmul.f32 %v1974_v34, %v2935_v60 }
 0x2f0   : > { %1469 = vperm.xlu0 %1950, %v1314_v45   ;;  %v1976_v9 = vpop.eup %1975  ;;  %vm1247_vm8 = vweird.f32 %v1974_v34  ;;  %1979 = vrcp.f32 %v2973_v52  ;;  %v1253_v1 = vor.u32 1.1754944e-38, %v1252_v29  ;;  %vm3011_vm14 = vcmp.eq.f32.partialorder %v1235_v23, 8.507059e+37 }
 0x2f1   : > { %v1294_v59 = vsel %vm2978_vm5, %v1968_v13, %v1290_v57  ;;  %v1275_v32 = vadd.f32 %v1970_v37, %v1274_v58  ;;  %v1259_v12 = vmul.f32 %v1972_v31, %v1258_v48  ;;  %v1243_v63 = vsub.f32 1.0, %v1242_v55  ;;  %vm3022_vm15 = vmor %vm1246_vm12, %vm1247_vm8  ;;  %v1150_v13 = vld [vmem:[#allocation3] sm:$0xff] }
 0x2f2   : > { %v1299_v62 = vsel %vm2952_vm1, %v1298_v22, %v1294_v59  ;;  %v1227_v3 = vmul.f32 %v1976_v9, %v2944_v20  ;;  %v1238_v5 = vor.u32 1.1754944e-38, %v1237_v49  ;;  %vm1232_vm1 = vweird.f32 %v1976_v9 }
 0x2f3   : > { %1464 = vperm.xlu1 %1951, %v1299_v62   ;;  %v1279_v14 = vsel %vm2989_vm7, %v1970_v37, %v1275_v32  ;;  %v1260_v24 = vadd.f32 %v1972_v31, %v1259_v12  ;;  %v1244_v54 = vmul.f32 %v1974_v34, %v1243_v63  ;;  %vm1216_vm3 = vweird.f32 %v2967_v26  ;;  %vm3040_vm10 = vmor %vm1231_vm11, %vm1232_vm1  ;;  %v1414_v37 = vld [vmem:[#allocation4 + $0x40] sm:$0xff] }
 0x2f4   : > { %v1978_v40 = vpop.eup %1977  ;;  %v1284_v0 = vsel %vm2956_vm2, %v1283_v36, %v1279_v14  ;;  %v1228_v50 = vsub.f32 1.0, %v1227_v3  ;;  %v1220_v16 = vand.u32 2147483647, %v2967_v26  ;;  %v1222_v60 = vand.u32 2147483648, %v2967_v26  ;;  %v1533_v3 = vld [vmem:[%s3220_s5 + $0x78] sm:$0xff] }
 0x2f5   : > { %1459 = vperm.xlu2 %1952, %v1284_v0   ;;  %v1264_v33 = vsel %vm3006_vm13, %v1972_v31, %v1260_v24  ;;  %v1245_v51 = vadd.f32 %v1974_v34, %v1244_v54  ;;  %v1212_v46 = vmul.f32 %v1978_v40, %v2967_v26  ;;  %vm1201_vm2 = vweird.f32 %v2973_v52  ;;  %v1420_v54 = vld [vmem:[#allocation4 + $0x78] sm:$0xff]  ;;  %v1532_v0 = vld [vmem:[%s3220_s5 + $0x70] sm:$0xff] }
 0x2f6   : > { %v1980_v19 = vpop.eup %1979  ;;  %v1269_v42 = vsel %vm2963_vm4, %v1268_v61, %v1264_v33  ;;  %v1229_v53 = vmul.f32 %v1976_v9, %v1228_v50  ;;  %vm1217_vm12 = vweird.f32 %v1978_v40  ;;  %v1207_v10 = vand.u32 2147483648, %v2973_v52 }
 0x2f7   : > { %v1249_v41 = vsel %vm3022_vm15, %v1974_v34, %v1245_v51  ;;  %v1213_v6 = vsub.f32 1.0, %v1212_v46  ;;  %v1197_v35 = vmul.f32 %v1980_v19, %v2973_v52  ;;  %1981 = vrcp.f32 %v1151_v18  ;;  %vm3053_vm0 = vmor %vm1216_vm3, %vm1217_vm12  ;;  %v1418_v46 = vld [vmem:[#allocation4 + $0x60] sm:$0xff] }
 0x2f8   : > { %1454 = vperm.xlu0 %1950, %v1269_v42   ;;  %v1254_v17 = vsel %vm2993_vm9, %v1253_v1, %v1249_v41  ;;  %v1230_v44 = vadd.f32 %v1976_v9, %v1229_v53  ;;  %vm1202_vm4 = vweird.f32 %v1980_v19  ;;  %v1205_v20 = vand.u32 2147483647, %v2973_v52  ;;  %v1417_v53 = vld [vmem:[#allocation4 + $0x38] sm:$0xff] }
 0x2f9   : > { %v1214_v15 = vmul.f32 %v1978_v40, %v1213_v6  ;;  %v1198_v22 = vsub.f32 1.0, %v1197_v35  ;;  %v1223_v45 = vor.u32 1.1754944e-38, %v1222_v60  ;;  %1983 = vrcp.f32 %v1150_v13  ;;  %vm1203_vm6 = vmor %vm1201_vm2, %vm1202_vm4  ;;  %v1530_v60 = vld [vmem:[%s3220_s5 + $0x60] sm:$0xff]  ;;  %v1416_v6 = vld [vmem:[#allocation4 + $0x10] sm:$0xff] }
 0x2fa   : > { %v1234_v25 = vsel %vm3040_vm10, %v1976_v9, %v1230_v44  ;;  %vm1221_vm5 = vcmp.eq.f32.partialorder %v1220_v16, 8.507059e+37  ;;  %v1208_v30 = vor.u32 1.1754944e-38, %v1207_v10  ;;  %vm1206_vm7 = vcmp.eq.f32.partialorder %v1205_v20, 8.507059e+37  ;;  %v1529_v35 = vld [vmem:[%s3220_s5 + $0x58] sm:$0xff]  ;;  %v1415_v10 = vld [vmem:[#allocation4 + $0x20] sm:$0xff] }
 0x2fb   : > { %1449 = vperm.xlu1 %1951, %v1254_v17   ;;  %v1239_v36 = vsel %vm3011_vm14, %v1238_v5, %v1234_v25  ;;  %v1215_v28 = vadd.f32 %v1978_v40, %v1214_v15  ;;  %v1199_v43 = vmul.f32 %v1980_v19, %v1198_v22  ;;  %vm1186_vm8 = vweird.f32 %v1151_v18  ;;  %v1419_v5 = vld [vmem:[#allocation4 + $0x70] sm:$0xff] }
 0x2fc   : > { %v1192_v34 = vand.u32 2147483648, %v1151_v18  ;;  %v1190_v52 = vand.u32 2147483647, %v1151_v18  ;;  %vm1171_vm11 = vweird.f32 %v1150_v13  ;;  %v1177_v49 = vand.u32 2147483648, %v1150_v13  ;;  %v1528_v22 = vld [vmem:[%s3220_s5 + $0x50] sm:$0xff] }
 0x2fd   : > { %1444 = vperm.xlu2 %1952, %v1239_v36   ;;  %v1219_v26 = vsel %vm3053_vm0, %v1978_v40, %v1215_v28  ;;  %v1200_v31 = vadd.f32 %v1980_v19, %v1199_v43  ;;  %v1982_v61 = vpop.eup %1981  ;;  %v1175_v48 = vand.u32 2147483647, %v1150_v13  ;;  %v1527_v36 = vld [vmem:[%s3220_s5 + $0x48] sm:$0xff]  ;;  %vm1607_vm2 = vcmask 64512  }
 0x2fe   : > { %v1224_v2 = vsel %vm1221_vm5, %v1223_v45, %v1219_v26  ;;  %v1182_v56 = vmul.f32 %v1982_v61, %v1151_v18  ;;  %vm1187_vm9 = vweird.f32 %v1982_v61  ;;  %v1193_v55 = vor.u32 1.1754944e-38, %v1192_v34  ;;  %v1531_v18 = vld [vmem:[%s3220_s5 + $0x68] sm:$0xff]  ;;  %v1526_v26 = vld [vmem:[%s3220_s5 + $0x40] sm:$0xff] }
 0x2ff   : > { %v1204_v29 = vsel %vm1203_vm6, %v1980_v19, %v1200_v31  ;;  %v1984_v39 = vpop.eup %1983  ;;  %vm1188_vm14 = vmor %vm1186_vm8, %vm1187_vm9  ;;  %vm1191_vm15 = vcmp.eq.f32.partialorder %v1190_v52, 8.507059e+37  ;;  %v1178_v47 = vor.u32 1.1754944e-38, %v1177_v49  ;;  %vm1176_vm3 = vcmp.eq.f32.partialorder %v1175_v48, 8.507059e+37  ;;  %v1411_v34 = vld [vmem:[#allocation4 + $0x68] sm:$0xff]  ;;  %v1586_v49 = vld [vmem:[%s3217_s2 + $0x78] sm:$0xff] }
 0x300   : > { %1439 = vperm.xlu0 %1950, %v1224_v2   ;;  %v1209_v7 = vsel %vm1206_vm7, %v1208_v30, %v1204_v29  ;;  %v1183_v21 = vsub.f32 1.0, %v1182_v56  ;;  %v1167_v23 = vmul.f32 %v1984_v39, %v1150_v13  ;;  %vm1172_vm13 = vweird.f32 %v1984_v39  ;;  %v1413_v30 = vld [vmem:[#allocation4 + $0x48] sm:$0xff]  ;;  %1587 = vmatpush.msra.mxu1 %v1586_v49 }
 0x301   : > { %vm1173_vm1 = vmor %vm1171_vm11, %vm1172_vm13  ;;  %v1412_v29 = vld [vmem:[#allocation4 + $0x8] sm:$0xff] }
 0x302   : > { %v1184_v57 = vmul.f32 %v1982_v61, %v1183_v21  ;;  %v1168_v58 = vsub.f32 1.0, %v1167_v23  ;;  %v1524_v23 = vld [vmem:[%s3220_s5 + $0x30] sm:$0xff] }
 0x303   : > { %1434 = vperm.xlu1 %1951, %v1209_v7  }
 0x304   : > { %v1185_v9 = vadd.f32 %v1982_v61, %v1184_v57  ;;  %v1169_v38 = vmul.f32 %v1984_v39, %v1168_v58  ;;  %v1585_v57 = vld [vmem:[%s3217_s2 + $0x70] sm:$0xff]  ;;  %v1584_v58 = vld [vmem:[%s3217_s2 + $0x68] sm:$0xff] }
 0x305   : > { %1588 = vmatpush.msra.mxu1 %v1585_v57 }
 0x306   : > { %v1189_v59 = vsel %vm1188_vm14, %v1982_v61, %v1185_v9  ;;  %v1170_v32 = vadd.f32 %v1984_v39, %v1169_v38  ;;  %v1410_v9 = vld [vmem:[#allocation4 + $0x50] sm:$0xff]  ;;  %v1523_v38 = vld [vmem:[%s3220_s5 + $0x28] sm:$0xff] }
 0x307   : > { %v1194_v12 = vsel %vm1191_vm15, %v1193_v55, %v1189_v59  ;;  %1589 = vmatpush.msra.mxu1 %v1584_v58 }
 0x308   : > { %1429 = vperm.xlu2 %1952, %v1194_v12   ;;  %v1174_v63 = vsel %vm1173_vm1, %v1984_v39, %v1170_v32  ;;  %v1525_v39 = vld [vmem:[%s3220_s5 + $0x38] sm:$0xff] }
 0x309   : > { %v1179_v62 = vsel %vm1176_vm3, %v1178_v47, %v1174_v63  ;;  %v1583_v47 = vld [vmem:[%s3217_s2 + $0x60] sm:$0xff]  ;;  %v1582_v32 = vld [vmem:[%s3217_s2 + $0x58] sm:$0xff] }
 0x30a   : > { %1424 = vperm.xlu0 %1950, %v1179_v62   ;;  %1590 = vmatpush.msra.mxu1 %v1583_v47  ;;  %v1409_v62 = vld [vmem:[#allocation4 + $0x18] sm:$0xff] }
 0x30c   : > { %1591 = vmatpush.msra.mxu1 %v1582_v32 }
 0x33e   : > { %v1480_v51 = vpop.permute.xlu2 %1479 }
 0x33f   : > { %v1513_v41 = vmul.f32 %v1480_v51, %v1417_v53  ;;  %v1407_v51 = vld [vmem:[#allocation4] sm:$0xff] }
 0x341   : > { %v1545_v44 = vmul.f32 %v1529_v35, %v1513_v41  ;;  %v1574_v35 = vld [vmem:[%s3217_s2 + $0x18] sm:$0xff] }
 0x346   : > { %v1475_v13 = vpop.permute.xlu2 %1474 }
 0x347   : > { %v1512_v17 = vmul.f32 %v1475_v13, %v1416_v6  ;;  %v1575_v6 = vld [vmem:[%s3217_s2 + $0x20] sm:$0xff] }
 0x349   : > { %v1544_v25 = vmul.f32 %v1528_v22, %v1512_v17 }
 0x34f   : > { %v1460_v31 = vpop.permute.xlu2 %1459 }
 0x350   : > { %v1509_v61 = vmul.f32 %v1460_v31, %v1413_v30 }
 0x352   : > { %v1500_v1 = vpop.permute.xlu0 %1499  ;;  %v1541_v21 = vmul.f32 %v1525_v39, %v1509_v61 }
 0x353   : > { %v1517_v11 = vmul.f32 %v1500_v1, %v1421_v4  ;;  %v1490_v14 = vpop.permute.xlu1 %1489  ;;  %v1522_v1 = vld [vmem:[%s3220_s5 + $0x20] sm:$0xff] }
 0x354   : > { %v1515_v50 = vmul.f32 %v1490_v14, %v1419_v5 }
 0x355   : > { %v1549_v24 = vmul.f32 %v1533_v3, %v1517_v11  ;;  %v1581_v3 = vld [vmem:[%s3217_s2 + $0x50] sm:$0xff]  ;;  %v1580_v11 = vld [vmem:[%s3217_s2 + $0x48] sm:$0xff] }
 0x356   : > { %v1547_v42 = vmul.f32 %v1531_v18, %v1515_v50  ;;  %1592 = vmatpush.msra.mxu1 %v1581_v3  ;;  %v1577_v18 = vld [vmem:[%s3217_s2 + $0x30] sm:$0xff] }
 0x357   : > { %1551 = vmatpush.xpose.msra.mxu0 %v1549_v24  ;;  %v1445_v59 = vpop.permute.xlu2 %1444 }
 0x358   : > { %v1506_v12 = vmul.f32 %v1445_v59, %v1410_v9  ;;  %1593 = vmatpush.msra.mxu1 %v1580_v11 }
 0x35a   : > { %v1495_v40 = vpop.permute.xlu0 %1494  ;;  %v1538_v24 = vmul.f32 %v1522_v1, %v1506_v12 }
 0x35b   : > { %v1516_v27 = vmul.f32 %v1495_v40, %v1420_v54  ;;  %v1485_v16 = vpop.permute.xlu1 %1484  ;;  %v1408_v54 = vld [vmem:[#allocation4 + $0x58] sm:$0xff] }
 0x35c   : > { %v1514_v19 = vmul.f32 %v1485_v16, %v1418_v46  ;;  %v1521_v40 = vld [vmem:[%s3220_s5 + $0x18] sm:$0xff]  ;;  %v1520_v16 = vld [vmem:[%s3220_s5 + $0x10] sm:$0xff] }
 0x35d   : > { %v1548_v33 = vmul.f32 %v1532_v0, %v1516_v27  ;;  %v1579_v0 = vld [vmem:[%s3217_s2 + $0x40] sm:$0xff]  ;;  %v1578_v27 = vld [vmem:[%s3217_s2 + $0x38] sm:$0xff] }
 0x35e   : > { %v1546_v8 = vmul.f32 %v1530_v60, %v1514_v19  ;;  %1594 = vmatpush.msra.mxu1 %v1579_v0  ;;  %v1576_v19 = vld [vmem:[%s3217_s2 + $0x28] sm:$0xff]  ;;  %v1406_v60 = vld [vmem:[#allocation4 + $0x30] sm:$0xff] }
 0x35f   : > { %1552 = vmatpush.xpose.msra.mxu0 %v1548_v33 }
 0x360   : > { %1595 = vmatpush.msra.mxu1 %v1578_v27 }
 0x362   : > { %v1470_v15 = vpop.permute.xlu0 %1469  ;;  %v1430_v46 = vpop.permute.xlu2 %1429  ;;  %1596 = vmatpush.msra.mxu1 %v1577_v18 }
 0x363   : > { %1553 = vmatpush.xpose.msra.mxu0 %v1547_v42  ;;  %v1511_v20 = vmul.f32 %v1470_v15, %v1415_v10  ;;  %v1503_v42 = vmul.f32 %v1430_v46, %v1407_v51  ;;  %v1573_v10 = vld [vmem:[%s3217_s2 + $0x10] sm:$0xff]  ;;  %v1572_v15 = vld [vmem:[%s3217_s2 + $0x8] sm:$0xff] }
 0x364   : > { %1597 = vmatpush.msra.mxu1 %v1576_v19 }
 0x365   : > { %v1465_v45 = vpop.permute.xlu1 %1464  ;;  %v1543_v43 = vmul.f32 %v1527_v36, %v1511_v20  ;;  %v1550_v20 = vld [vmem:[%s3218_s3] sm:$0xff] }
 0x366   : > { %v1510_v28 = vmul.f32 %v1465_v45, %v1414_v37  ;;  %1598 = vmatpush.msra.mxu1 %v1575_v6 }
 0x367   : > { %1554 = vmatpush.xpose.msra.mxu0 %v1546_v8  ;;  %v1519_v8 = vld [vmem:[%s3220_s5 + $0x8] sm:$0xff] }
 0x368   : > { %v1542_v2 = vmul.f32 %v1526_v26, %v1510_v28  ;;  %v1535_v17 = vmul.f32 %v1519_v8, %v1503_v42  ;;  %1599 = vmatpush.msra.mxu1 %v1574_v35 }
 0x36a   : > { %v1455_v56 = vpop.permute.xlu0 %1454  ;;  %1600 = vmatpush.msra.mxu1 %v1573_v10 }
 0x36b   : > { %1555 = vmatpush.xpose.msra.mxu0 %v1545_v44  ;;  %v1508_v7 = vmul.f32 %v1455_v56, %v1412_v29  ;;  %v1518_v44 = vld [vmem:[%s3220_s5] sm:$0xff] }
 0x36c   : > { %1601 = vmatpush.msra.mxu1 %v1572_v15 }
 0x36d   : > { %v1450_v52 = vpop.permute.xlu1 %1449  ;;  %v1540_v55 = vmul.f32 %v1524_v23, %v1508_v7 }
 0x36e   : > { %v1507_v48 = vmul.f32 %v1450_v52, %v1411_v34 }
 0x36f   : > { %1556 = vmatpush.xpose.msra.mxu0 %v1544_v25  ;;  %v1571_v25 = vld [vmem:[%s3217_s2] sm:$0xff] }
 0x370   : > { %v1539_v63 = vmul.f32 %v1523_v38, %v1507_v48  ;;  %1602 = vmatpush.msra.mxu1 %v1571_v25 }
 0x372   : > { %v1440_v4 = vpop.permute.xlu0 %1439 }
 0x373   : > { %1557 = vmatpush.xpose.msra.mxu0 %v1543_v43  ;;  %v1505_v14 = vmul.f32 %v1440_v4, %v1409_v62 }
 0x375   : > { %v1435_v5 = vpop.permute.xlu1 %1434  ;;  %v1537_v33 = vmul.f32 %v1521_v40, %v1505_v14 }
 0x376   : > { %v1504_v50 = vmul.f32 %v1435_v5, %v1408_v54 }
 0x377   : > { %1558 = vmatpush.xpose.msra.mxu0 %v1542_v2 }
 0x378   : > { %v1536_v53 = vmul.f32 %v1520_v16, %v1504_v50 }
 0x37b   : > { %1559 = vmatpush.xpose.msra.mxu0 %v1541_v21 }
 0x37c   : > { %v1425_v41 = vpop.permute.xlu0 %1424 }
 0x37d   : > { %v1502_v13 = vmul.f32 %v1425_v41, %v1406_v60 }
 0x37f   : > { %1560 = vmatpush.xpose.msra.mxu0 %v1540_v55  ;;  %v1534_v22 = vmul.f32 %v1518_v44, %v1502_v13 }
 0x383   : > { %1561 = vmatpush.xpose.msra.mxu0 %v1539_v63 }
 0x387   : > { %1562 = vmatpush.xpose.msra.mxu0 %v1538_v24 }
 0x38b   : > { %1563 = vmatpush.xpose.msra.mxu0 %v1537_v33 }
 0x38f   : > { %1564 = vmatpush.xpose.msra.mxu0 %v1536_v53 }
 0x393   : > { %1565 = vmatpush.xpose.msra.mxu0 %v1535_v17 }
 0x397   : > { %1566 = vmatpush.xpose.msra.mxu0 %v1534_v22 }
 0x39a   : > { %1567 = vmatmul.f32.vlgmr.msra.gmra.mxu0 %v1550_v20 }
 0x417   : > { %v1568_v37 = vpop.f32.mrf.mxu0 }
 0x418   : > { %1603 = vmatmul.f32.vlgmr.msra.gmra.mxu1 %v1568_v37 }
 0x495   : > { %v1604_v45 = vpop.f32.mrf.mxu1 }
 0x496   : > { %1608 = vst.msk [vmem:[#allocation5] sm:$0xff] %vm1607_vm2, %v1604_v45 }
 0x497 PF: > { %p1782_p2 = scmp.ne.s32.totalorder %s2064_s24, 1 }
 0x498   : > { %s3277_s12 = scalar_lea.vmem (!%p1782_p2), [#allocation6], %s2195_s15 }
 0x499   : > { %1611 = sbr.rel (%p1782_p2) target bundleno = 1313 (0x521), region = 60 }
 0x49e   : > { %v1612_v36 = vld [vmem:[%s2202_s20] sm:$0xff]  ;;  %vm1620_vm10 = vcmask 64512   ;;  %v2086_v30 = vmov 0  }
 0x49f   : > { %v1613_v28 = vld [vmem:[#allocation5] sm:$0xff]  ;;  %1639 = vmatpush.msra.mxu0 %v1612_v36  ;;  %1985 = vset.pattern.permute.xlu0 %v2086_v30 }
 0x4a0   : > { %v1614_v43 = vld [vmem:[%s3219_s4] sm:$0xff]  ;;  %1783 = vmatmul.msk.f32.vlgmr.msra.gmra.mxu0 %vm1620_vm10, %v1613_v28 }
 0x4a1   : > { %1617 = vperm.xlu0 %1985, %v1614_v43  }
 0x513   : > { %v1618_v26 = vpop.permute.xlu0 %1617 }
 0x51d   : > { %v1641_v31 = vpop.f32.mrf.mxu0 }
 0x51e   : > { %v1642_v61 = vadd.f32 %v1641_v31, %v1618_v26 }
 0x520   : > { %1644 = vst [vmem:[%s3277_s12] sm:$0xff] %v1642_v61 }
 0x521 PF: > { %s1785_s24 = sshll.u32 %s2068_s25, 3  ;;  %s3278_s18 = scalar_lea.vmem [#allocation6], %s2195_s15 }
 0x522   : > { %s1658_s17 = scalar_lea.hbm %s3221_s6, %s1785_s24  ;;  %s1660_s14 = sshll.u32 %s3278_s18, 4  ;;  %s1661_s14 = int_to_ptr.vmem [resolvable:$true] %s1660_s14 }
 0x523   : > { %s1662_s19 = sshll.u32 %s1658_s17, 4  ;;  %s3279_s30 = sand.u32 1, %s2056_s22   ;;  %s1663_s19 = int_to_ptr.hbm [resolvable:$true] %s1662_s19 }
 0x524   : > { %s1646_s29 = scalar_lea.sflag [#allocation7], %s3279_s30  ;;  %s2000_s11 = sshra.s32 %s1663_s19, 4  ;;  %s2001_s11 = int_to_ptr.hbm [resolvable:$true] %s2000_s11 }
 0x525   : > { %s2002_s12 = scalar_lea.hbm %s2001_s11, 8  ;;  %s2006_s1 = scalar_lea.hbm %s3221_s6, 16 }
 0x526   : > { %p2003_p4 = scmp.ne.s32.totalorder %s2001_s11, %s2002_s12  ;;  %p2007_p7 = scmp.lt.s32.totalorder %s2001_s11, %s3221_s6 }
 0x527   : > { %p2008_p8 = scmp.lt.s32.totalorder %s2006_s1, %s2002_s12 }
 0x528   : > { %p2004_p5 = pnand %p2003_p4, %p2171_p3 }
 0x529   : > { %p2009_p10 = por %p2008_p8, %p2007_p7 }
 0x52a   : > { %p2005_p6 = pneg %p2004_p5 }
 0x52c   : > { %p2010_p11 = pnand %p2009_p10, %p2005_p6 }
 0x52e   : > { %2013 = shalt.err (!%p2010_p11)
}
 0x52f   : > { %1807 = dma.vmem_to_hbm [thread:$0]  (%p2171_p3), %s1661_s14, 128, %s1663_s19, %s1646_s29  }
 0x530 PF: > { %p1813_p12 = scmp.ge.s32.totalorder %s2080_s28, 2  ;;  %s1674_s15 = sand.u32 1, %s2052_s21  }
 0x531   : > { %s1675_s0 = scalar_lea.sflag [#allocation7], %s1674_s15 }
 0x532   : > { %p1810_p13 = pnand %p1813_p12, %p2181_p9 }
 0x534   : > { %p1811_p0 = pneg %p1810_p13 }
 0x536   : > { %2047 = dma.done.wait (%p1811_p0), %s1675_s0, 128  }
 0x537   : > { %2049 = vsyncadd (%p1811_p0), %s1675_s0, 4294967168  ;;  %s19_s28 = sadd.s32 1, %s2080_s28   ;;  %s3280_s21 = smov %s2056_s22 }
 0x538   : > { %p16_p1 = scmp.ge.s32.totalorder %s19_s28, 6   ;;  %s3281_s22 = smov %s2060_s23 }
 0x539   : > { %s3282_s23 = smov %s2189_s13  ;;  %s3283_s24 = smov %s2072_s26 }
 0x53a   : > { %s3284_s25 = smov %s2076_s27  ;;  %s3285_s26 = smov %s3288_s7 }
 0x53b   : > { %s3286_s27 = smov %s3292_s8  ;;  %18 = sbr.rel (!%p16_p1) target bundleno = 8 (0x8), region = 95 }
 0x540   :  { %1681 = vsyncpa [#allocation7], 1 }
 0x541   :  { %1683 = vsyncpa [#allocation7 + $0x1], 1 }

</bundles_post_ra>
